<compile_context>
chip_gen: v5e
topology: v5e:2x2
jax: 0.10.0
libtpu: 0.0.40
codegen_flags: <defaults>
</compile_context>

<pallas_src>
import functools
import math

import jax
import jax.numpy as jnp
from jax.experimental import pallas as pl
from jax.experimental.pallas import tpu as pltpu

_NEG_HALF_LOG_2PI = -0.5 * math.log(2.0 * math.pi)

TOK_BLK = 128   # token rows per grid step (sublane dim of the gathered-output tile)
V_BLK = 128     # vocab rows per grid step (contraction dim of the one-hot matmul)
LANE = 128      # lane padding for the embedding dim


def _round_up(x, m):
    return (x + m - 1) // m * m


# ----------------------------------------------------------------------------
# Pallas kernel: fused reparameterize + KL partials + one-hot-matmul gather.
# Grid = (token blocks, vocab blocks); vocab is the reduction (innermost) axis.
# ----------------------------------------------------------------------------
def _var_embed_kernel(ids_ref, mean_ref, rho_ref, eps_ref,
                      out_ref, klp_ref, klq_ref,
                      *, vocab, emb_dim, sigma_prior):
    """
    ids_ref  : (TOK_BLK, 1)     int32  token ids of this token block
    mean_ref : (V_BLK, E_pad)   f32    vocab tile of the mean table
    rho_ref  : (V_BLK, E_pad)   f32    vocab tile of rho
    eps_ref  : (V_BLK, E_pad)   f32    vocab tile of the N(0,1) noise
    out_ref  : (TOK_BLK, E_pad) f32    gathered embeddings (accumulated over vocab tiles)
    klp_ref  : (1, E_pad)       f32    per-lane partial sums of log_p_w
    klq_ref  : (1, E_pad)       f32    per-lane partial sums of log_q_w
    """
    t = pl.program_id(0)   # token-block index
    v = pl.program_id(1)   # vocab-block index (reduction axis)

    mean = mean_ref[...]
    rho = rho_ref[...]
    eps = eps_ref[...]

    std = jnp.log(1.0 + jnp.exp(rho))      # matches torch.log(1.0 + torch.exp(rho))
    emb = mean + std * eps                 # reparameterized embedding tile

    # ---- gather: one-hot(ids) @ emb on the MXU, accumulated over vocab tiles ----
    @pl.when(v == 0)
    def _():
        out_ref[...] = jnp.zeros_like(out_ref)

    tok_blk, v_blk = out_ref.shape[0], emb.shape[0]
    col = v * v_blk + jax.lax.broadcasted_iota(jnp.int32, (tok_blk, v_blk), 1)
    onehot = (ids_ref[...] == col).astype(jnp.float32)          # (TOK_BLK, V_BLK)
    out_ref[...] += jnp.dot(onehot, emb,
                            precision=jax.lax.Precision.HIGHEST,
                            preferred_element_type=jnp.float32)

    # ---- KL partial sums: computed once (token-block 0), masked for padding ----
    @pl.when(t == 0)
    def _():
        @pl.when(v == 0)
        def _():
            klp_ref[...] = jnp.zeros_like(klp_ref)
            klq_ref[...] = jnp.zeros_like(klq_ref)

        rows = v * v_blk + jax.lax.broadcasted_iota(jnp.int32, emb.shape, 0)
        cols = jax.lax.broadcasted_iota(jnp.int32, emb.shape, 1)
        valid = jnp.logical_and(rows < vocab, cols < emb_dim)

        log_sig_p = math.log(sigma_prior)
        log_p = (_NEG_HALF_LOG_2PI - log_sig_p
                 - emb * emb / (2.0 * sigma_prior * sigma_prior))
        log_q = (_NEG_HALF_LOG_2PI - jnp.log(std)
                 - (emb - mean) ** 2 / (2.0 * std * std))

        klp_ref[...] += jnp.sum(jnp.where(valid, log_p, 0.0), axis=0, keepdims=True)
        klq_ref[...] += jnp.sum(jnp.where(valid, log_q, 0.0), axis=0, keepdims=True)


# ----------------------------------------------------------------------------
# Wrapper: padding / layout plumbing + pallas_call + final tiny reductions.
# ----------------------------------------------------------------------------
def variational_embeddings_fwd(data, mean, rho, eps, sigma_prior=1.0, training=True):
    """Forward pass of VariationalEmbeddings.

    data: (B, S) int token ids; mean/rho/eps: (V, E) float32.
    Returns (var_data (B,S,E) f32, log_p_w scalar, log_q_w scalar).
    In eval mode (training=False) the lookup uses `mean` and the KL terms are 0.
    """
    B, S = data.shape
    V, E = mean.shape
    N = B * S

    if not training:
        eps = jnp.zeros_like(mean)   # emb == mean in eval mode

    N_pad = _round_up(N, TOK_BLK)
    V_pad = _round_up(V, V_BLK)
    E_pad = _round_up(E, LANE)

    ids = jnp.zeros((N_pad, 1), jnp.int32).at[:N, 0].set(
        data.reshape(-1).astype(jnp.int32))

    def pad2(a):
        return jnp.pad(a.astype(jnp.float32), ((0, V_pad - V), (0, E_pad - E)))

    mean_p, rho_p, eps_p = pad2(mean), pad2(rho), pad2(eps)

    grid = (N_pad // TOK_BLK, V_pad // V_BLK)

    kernel = functools.partial(_var_embed_kernel, vocab=V, emb_dim=E,
                               sigma_prior=float(sigma_prior))

    out_flat, klp, klq = pl.pallas_call(
        kernel,
        out_shape=(
            jax.ShapeDtypeStruct((N_pad, E_pad), jnp.float32),
            jax.ShapeDtypeStruct((1, E_pad), jnp.float32),
            jax.ShapeDtypeStruct((1, E_pad), jnp.float32),
        ),
        grid=grid,
        in_specs=[
            pl.BlockSpec((TOK_BLK, 1), lambda t, v: (t, 0)),      # token ids
            pl.BlockSpec((V_BLK, E_pad), lambda t, v: (v, 0)),    # mean tile
            pl.BlockSpec((V_BLK, E_pad), lambda t, v: (v, 0)),    # rho tile
            pl.BlockSpec((V_BLK, E_pad), lambda t, v: (v, 0)),    # eps tile
        ],
        out_specs=(
            pl.BlockSpec((TOK_BLK, E_pad), lambda t, v: (t, 0)),  # gathered embeddings
            pl.BlockSpec((1, E_pad), lambda t, v: (0, 0)),        # log_p lane partials
            pl.BlockSpec((1, E_pad), lambda t, v: (0, 0)),        # log_q lane partials
        ),
        compiler_params=pltpu.CompilerParams(
            # vocab axis is a reduction into resident outputs; token axis kept
            # "arbitrary" because the KL outputs are shared across token blocks.
            dimension_semantics=("arbitrary", "arbitrary")),
    )(ids, mean_p, rho_p, eps_p)

    var_data = out_flat[:N, :E].reshape(B, S, E)
    if training:
        log_p_w = jnp.sum(klp)
        log_q_w = jnp.sum(klq)
    else:
        log_p_w = jnp.float32(0.0)
        log_q_w = jnp.float32(0.0)
    return var_data, log_p_w, log_q_w


# ----------------------------------------------------------------------------
# Pure-JAX reference (for correctness check only).
# ----------------------------------------------------------------------------
def _log_gaussian(x, mu, sigma, log_sigma):
    return _NEG_HALF_LOG_2PI - log_sigma - (x - mu) ** 2 / (2.0 * sigma ** 2)


def variational_embeddings_ref(data, mean, rho, eps, sigma_prior=1.0, training=True):
    if training:
        std = jnp.log(1.0 + jnp.exp(rho))
        emb = mean + std * eps
        log_p = jnp.sum(_log_gaussian(emb, 0.0, sigma_prior, math.log(sigma_prior)))
        log_q = jnp.sum(_log_gaussian(emb, mean, std, jnp.log(std)))
    else:
        emb = mean
        log_p = jnp.float32(0.0)
        log_q = jnp.float32(0.0)
    B, S = data.shape
    var = jnp.take(emb, data.reshape(-1).astype(jnp.int32), axis=0)
    return var.reshape(B, S, emb.shape[1]), log_p, log_q


if __name__ == "__main__":
    B, S, V, E = 2, 8, 200, 32   # batch=2, seq=8, vocab=200, embedding=32

    key = jax.random.PRNGKey(0)
    k_data, k_mean, k_rho, k_eps = jax.random.split(key, 4)
    data = jax.random.randint(k_data, (B, S), 0, V, dtype=jnp.int32)
    mean = 0.1 * jax.random.normal(k_mean, (V, E), jnp.float32)
    rho = -3.0 + 0.5 * jax.random.normal(k_rho, (V, E), jnp.float32)
    eps = jax.random.normal(k_eps, (V, E), jnp.float32)   # torch.randn_like(std)

    # training-mode forward (reparameterized lookup + KL terms)
    var, lp, lq = variational_embeddings_fwd(data, mean, rho, eps,
                                             sigma_prior=1.0, training=True)
    var = jax.block_until_ready(var)
    assert var.shape == (B, S, E), var.shape

    var_r, lp_r, lq_r = variational_embeddings_ref(data, mean, rho, eps, 1.0, True)
    assert jnp.allclose(var, var_r, atol=1e-5, rtol=1e-5), \
        float(jnp.max(jnp.abs(var - var_r)))
    assert abs(float(lp) - float(lp_r)) <= 1e-2 + 1e-4 * abs(float(lp_r)), \
        (float(lp), float(lp_r))
    assert abs(float(lq) - float(lq_r)) <= 1e-2 + 1e-4 * abs(float(lq_r)), \
        (float(lq), float(lq_r))

    # eval-mode forward (plain mean lookup)
    var_e, _, _ = variational_embeddings_fwd(data, mean, rho, eps, training=False)
    var_e = jax.block_until_ready(var_e)
    var_e_ref, _, _ = variational_embeddings_ref(data, mean, rho, eps, 1.0, False)
    assert jnp.allclose(var_e, var_e_ref, atol=1e-5, rtol=1e-5)

    print("KERNEL_OK")
</pallas_src>

<mosaic_0001>
module attributes {stable_mosaic.version = 11 : i64} {
  func.func @_var_embed_kernel(%arg0: i32, %arg1: i32, %arg2: memref<128x1xi32, #tpu.memory_space<vmem>>, %arg3: memref<128x128xf32, #tpu.memory_space<vmem>>, %arg4: memref<128x128xf32, #tpu.memory_space<vmem>>, %arg5: memref<128x128xf32, #tpu.memory_space<vmem>>, %arg6: memref<128x128xf32, #tpu.memory_space<vmem>>, %arg7: memref<1x128xf32, #tpu.memory_space<vmem>>, %arg8: memref<1x128xf32, #tpu.memory_space<vmem>>) attributes {dimension_semantics = [#tpu.dimension_semantics<arbitrary>, #tpu.dimension_semantics<arbitrary>], iteration_bounds = array<i64: 1, 2>, scalar_prefetch = 0 : i64, scratch_operands = 0 : i64, tpu.core_type = #tpu.core_type<tc>, window_params = [{transform_indices = @transform_0, window_bounds = array<i64: 128, 1>}, {transform_indices = @transform_1, window_bounds = array<i64: 128, 128>}, {transform_indices = @transform_2, window_bounds = array<i64: 128, 128>}, {transform_indices = @transform_3, window_bounds = array<i64: 128, 128>}, {transform_indices = @transform_4, window_bounds = array<i64: 128, 128>}, {pipeline_mode = #tpu.pipeline_mode<synchronous>, transform_indices = @transform_5, window_bounds = array<i64: 1, 128>}, {pipeline_mode = #tpu.pipeline_mode<synchronous>, transform_indices = @transform_6, window_bounds = array<i64: 1, 128>}]} {
    %c0 = arith.constant 0 : index
    %c0_0 = arith.constant 0 : index
    %0 = vector.load %arg3[%c0, %c0_0] : memref<128x128xf32, #tpu.memory_space<vmem>>, vector<128x128xf32>
    %c0_1 = arith.constant 0 : index
    %c0_2 = arith.constant 0 : index
    %1 = vector.load %arg4[%c0_1, %c0_2] : memref<128x128xf32, #tpu.memory_space<vmem>>, vector<128x128xf32>
    %c0_3 = arith.constant 0 : index
    %c0_4 = arith.constant 0 : index
    %2 = vector.load %arg5[%c0_3, %c0_4] : memref<128x128xf32, #tpu.memory_space<vmem>>, vector<128x128xf32>
    %3 = math.exp %1 : vector<128x128xf32>
    %cst = arith.constant 1.000000e+00 : f32
    %4 = vector.broadcast %cst : f32 to vector<128x128xf32>
    %5 = arith.addf %4, %3 : vector<128x128xf32>
    %6 = math.log %5 : vector<128x128xf32>
    %7 = arith.mulf %6, %2 : vector<128x128xf32>
    %8 = arith.addf %0, %7 : vector<128x128xf32>
    %c0_i32 = arith.constant 0 : i32
    %9 = arith.cmpi eq, %arg1, %c0_i32 : i32
    %10 = arith.extui %9 : i1 to i32
    %c0_i32_5 = arith.constant 0 : i32
    %11 = arith.cmpi ne, %10, %c0_i32_5 : i32
    scf.if %11 {
      %cst_15 = arith.constant 0.000000e+00 : f32
      %28 = vector.broadcast %cst_15 : f32 to vector<128x128xf32>
      %c0_16 = arith.constant 0 : index
      %c0_17 = arith.constant 0 : index
      %29 = vector.load %arg6[%c0_16, %c0_17] : memref<128x128xf32, #tpu.memory_space<vmem>>, vector<128x128xf32>
      tpu.vector_store %arg6[%c0_16, %c0_17], %28 {strides = array<i32>} : memref<128x128xf32, #tpu.memory_space<vmem>>, vector<128x128xf32>,
    } else {
    }
    %c128_i32 = arith.constant 128 : i32
    %12 = arith.muli %arg1, %c128_i32 : i32
    %13 = tpu.iota {dimensions = array<i32: 1>} : vector<128x128xi32>
    %14 = vector.broadcast %12 : i32 to vector<128x128xi32>
    %15 = arith.addi %14, %13 : vector<128x128xi32>
    %c0_6 = arith.constant 0 : index
    %c0_7 = arith.constant 0 : index
    %16 = vector.load %arg2[%c0_6, %c0_7] : memref<128x1xi32, #tpu.memory_space<vmem>>, vector<128x1xi32>
    %17 = vector.broadcast %16 : vector<128x1xi32> to vector<128x128xi32>
    %18 = arith.cmpi eq, %17, %15 : vector<128x128xi32>
    %19 = arith.extui %18 : vector<128x128xi1> to vector<128x128xi32>
    %20 = arith.sitofp %19 : vector<128x128xi32> to vector<128x128xf32>
    %c0_8 = arith.constant 0 : index
    %c0_9 = arith.constant 0 : index
    %21 = vector.load %arg6[%c0_8, %c0_9] : memref<128x128xf32, #tpu.memory_space<vmem>>, vector<128x128xf32>
    %cst_10 = arith.constant dense<0.000000e+00> : vector<128x128xf32>
    %22 = tpu.matmul %20, %8, %cst_10 {dimension_numbers = #tpu.dot_dimension_numbers<[1], [0], [0], [1], [0, 0, 1, 1], [], []>, precision = #tpu.contract_precision<fp32>} : vector<128x128xf32>, vector<128x128xf32>, vector<128x128xf32> -> vector<128x128xf32>
    %23 = arith.addf %21, %22 : vector<128x128xf32>
    %c0_11 = arith.constant 0 : index
    %c0_12 = arith.constant 0 : index
    %24 = vector.load %arg6[%c0_11, %c0_12] : memref<128x128xf32, #tpu.memory_space<vmem>>, vector<128x128xf32>
    tpu.vector_store %arg6[%c0_11, %c0_12], %23 {strides = array<i32>} : memref<128x128xf32, #tpu.memory_space<vmem>>, vector<128x128xf32>,
    %c0_i32_13 = arith.constant 0 : i32
    %25 = arith.cmpi eq, %arg0, %c0_i32_13 : i32
    %26 = arith.extui %25 : i1 to i32
    %c0_i32_14 = arith.constant 0 : i32
    %27 = arith.cmpi ne, %26, %c0_i32_14 : i32
    scf.if %27 {
      %c0_i32_15 = arith.constant 0 : i32
      %28 = arith.cmpi eq, %arg1, %c0_i32_15 : i32
      %29 = arith.extui %28 : i1 to i32
      %c0_i32_16 = arith.constant 0 : i32
      %30 = arith.cmpi ne, %29, %c0_i32_16 : i32
      scf.if %30 {
        %cst_34 = arith.constant 0.000000e+00 : f32
        %70 = vector.broadcast %cst_34 : f32 to vector<1x128xf32>
        %c0_35 = arith.constant 0 : index
        %c0_36 = arith.constant 0 : index
        %71 = vector.load %arg7[%c0_35, %c0_36] : memref<1x128xf32, #tpu.memory_space<vmem>>, vector<1x128xf32>
        tpu.vector_store %arg7[%c0_35, %c0_36], %70 {strides = array<i32>} : memref<1x128xf32, #tpu.memory_space<vmem>>, vector<1x128xf32>,
        %cst_37 = arith.constant 0.000000e+00 : f32
        %72 = vector.broadcast %cst_37 : f32 to vector<1x128xf32>
        %c0_38 = arith.constant 0 : index
        %c0_39 = arith.constant 0 : index
        %73 = vector.load %arg8[%c0_38, %c0_39] : memref<1x128xf32, #tpu.memory_space<vmem>>, vector<1x128xf32>
        tpu.vector_store %arg8[%c0_38, %c0_39], %72 {strides = array<i32>} : memref<1x128xf32, #tpu.memory_space<vmem>>, vector<1x128xf32>,
      } else {
      }
      %c128_i32_17 = arith.constant 128 : i32
      %31 = arith.muli %arg1, %c128_i32_17 : i32
      %32 = tpu.iota {dimensions = array<i32: 0>} : vector<128x128xi32>
      %33 = vector.broadcast %31 : i32 to vector<128x128xi32>
      %34 = arith.addi %33, %32 : vector<128x128xi32>
      %35 = tpu.iota {dimensions = array<i32: 1>} : vector<128x128xi32>
      %c200_i32 = arith.constant 200 : i32
      %36 = vector.broadcast %c200_i32 : i32 to vector<128x128xi32>
      %37 = arith.cmpi slt, %34, %36 : vector<128x128xi32>
      %c32_i32 = arith.constant 32 : i32
      %38 = vector.broadcast %c32_i32 : i32 to vector<128x128xi32>
      %39 = arith.cmpi slt, %35, %38 : vector<128x128xi32>
      %40 = arith.andi %37, %39 : vector<128x128xi1>
      %41 = arith.mulf %8, %8 : vector<128x128xf32>
      %cst_18 = arith.constant 2.000000e+00 : f32
      %42 = vector.broadcast %cst_18 : f32 to vector<128x128xf32>
      %43 = arith.divf %41, %42 : vector<128x128xf32>
      %cst_19 = arith.constant -0.918938517 : f32
      %44 = vector.broadcast %cst_19 : f32 to vector<128x128xf32>
      %45 = arith.subf %44, %43 : vector<128x128xf32>
      %46 = math.log %6 : vector<128x128xf32>
      %cst_20 = arith.constant -0.918938517 : f32
      %47 = vector.broadcast %cst_20 : f32 to vector<128x128xf32>
      %48 = arith.subf %47, %46 : vector<128x128xf32>
      %49 = arith.subf %8, %0 : vector<128x128xf32>
      %50 = arith.mulf %49, %49 : vector<128x128xf32>
      %cst_21 = arith.constant 2.000000e+00 : f32
      %51 = vector.broadcast %cst_21 : f32 to vector<128x128xf32>
      %52 = arith.mulf %51, %6 : vector<128x128xf32>
      %53 = arith.mulf %52, %6 : vector<128x128xf32>
      %54 = arith.divf %50, %53 : vector<128x128xf32>
      %55 = arith.subf %48, %54 : vector<128x128xf32>
      %c0_22 = arith.constant 0 : index
      %c0_23 = arith.constant 0 : index
      %56 = vector.load %arg7[%c0_22, %c0_23] : memref<1x128xf32, #tpu.memory_space<vmem>>, vector<1x128xf32>
      %cst_24 = arith.constant 0.000000e+00 : f32
      %57 = vector.broadcast %cst_24 : f32 to vector<128x128xf32>
      %58 = arith.select %40, %45, %57 : vector<128x128xi1>, vector<128x128xf32>
      %cst_25 = arith.constant dense<0.000000e+00> : vector<128xf32>
      %59 = vector.multi_reduction <add>, %58, %cst_25 [0] : vector<128x128xf32> to vector<128xf32>
      %60 = vector.shape_cast %59 : vector<128xf32> to vector<1x128xf32>
      %61 = arith.addf %56, %60 : vector<1x128xf32>
      %c0_26 = arith.constant 0 : index
      %c0_27 = arith.constant 0 : index
      %62 = vector.load %arg7[%c0_26, %c0_27] : memref<1x128xf32, #tpu.memory_space<vmem>>, vector<1x128xf32>
      tpu.vector_store %arg7[%c0_26, %c0_27], %61 {strides = array<i32>} : memref<1x128xf32, #tpu.memory_space<vmem>>, vector<1x128xf32>,
      %c0_28 = arith.constant 0 : index
      %c0_29 = arith.constant 0 : index
      %63 = vector.load %arg8[%c0_28, %c0_29] : memref<1x128xf32, #tpu.memory_space<vmem>>, vector<1x128xf32>
      %cst_30 = arith.constant 0.000000e+00 : f32
      %64 = vector.broadcast %cst_30 : f32 to vector<128x128xf32>
      %65 = arith.select %40, %55, %64 : vector<128x128xi1>, vector<128x128xf32>
      %cst_31 = arith.constant dense<0.000000e+00> : vector<128xf32>
      %66 = vector.multi_reduction <add>, %65, %cst_31 [0] : vector<128x128xf32> to vector<128xf32>
      %67 = vector.shape_cast %66 : vector<128xf32> to vector<1x128xf32>
      %68 = arith.addf %63, %67 : vector<1x128xf32>
      %c0_32 = arith.constant 0 : index
      %c0_33 = arith.constant 0 : index
      %69 = vector.load %arg8[%c0_32, %c0_33] : memref<1x128xf32, #tpu.memory_space<vmem>>, vector<1x128xf32>
      tpu.vector_store %arg8[%c0_32, %c0_33], %68 {strides = array<i32>} : memref<1x128xf32, #tpu.memory_space<vmem>>, vector<1x128xf32>,
    } else {
    }
    return
  }
  func.func @transform_0(%arg0: i32, %arg1: i32) -> (i32, i32) {
    %c0_i32 = arith.constant 0 : i32
    %c0_i32_0 = arith.constant 0 : i32
    return %arg0, %c0_i32 : i32, i32
  }
  func.func @transform_1(%arg0: i32, %arg1: i32) -> (i32, i32) {
    %c0_i32 = arith.constant 0 : i32
    %c0_i32_0 = arith.constant 0 : i32
    return %arg1, %c0_i32 : i32, i32
  }
  func.func @transform_2(%arg0: i32, %arg1: i32) -> (i32, i32) {
    %c0_i32 = arith.constant 0 : i32
    %c0_i32_0 = arith.constant 0 : i32
    return %arg1, %c0_i32 : i32, i32
  }
  func.func @transform_3(%arg0: i32, %arg1: i32) -> (i32, i32) {
    %c0_i32 = arith.constant 0 : i32
    %c0_i32_0 = arith.constant 0 : i32
    return %arg1, %c0_i32 : i32, i32
  }
  func.func @transform_4(%arg0: i32, %arg1: i32) -> (i32, i32) {
    %c0_i32 = arith.constant 0 : i32
    %c0_i32_0 = arith.constant 0 : i32
    return %arg0, %c0_i32 : i32, i32
  }
  func.func @transform_5(%arg0: i32, %arg1: i32) -> (i32, i32) {
    %c0_i32 = arith.constant 0 : i32
    %c0_i32_0 = arith.constant 0 : i32
    %c0_i32_1 = arith.constant 0 : i32
    return %c0_i32, %c0_i32_0 : i32, i32
  }
  func.func @transform_6(%arg0: i32, %arg1: i32) -> (i32, i32) {
    %c0_i32 = arith.constant 0 : i32
    %c0_i32_0 = arith.constant 0 : i32
    %c0_i32_1 = arith.constant 0 : i32
    return %c0_i32, %c0_i32_0 : i32, i32
  }
}

</mosaic_0001>

<bundles_post_ra>
// kernel: tpu_custom_call.1
= control target key start
LH: loop header
LB: loop body
LE: loop exit
PB: predicated region body
PF: predicated region fallthrough
CT: control target
= control target key end

     0   :  { %s5291_s0 = inlined_call_operand.vmem [shape: s32[128,1], index: 0, kind: input, shape index: {}]   ;;  %s5292_s1 = inlined_call_operand.hbm [shape: f32[256,128], index: 1, kind: input, shape index: {}]   ;;  %s5293_s2 = inlined_call_operand.hbm [shape: f32[256,128], index: 2, kind: input, shape index: {}]   ;;  %s5294_s3 = inlined_call_operand.hbm [shape: f32[256,128], index: 3, kind: input, shape index: {}]   ;;  %s5295_s4 = inlined_call_operand.hbm [shape: f32[128,128], index: 4, kind: output, shape index: {0}]   ;;  %s5296_s5 = inlined_call_operand.hbm [shape: f32[1,128], index: 5, kind: output, shape index: {1}]   ;;  %s5297_s6 = inlined_call_operand.hbm [shape: f32[1,128], index: 6, kind: output, shape index: {2}]  }
   0x1   :  { %5416 = sst [smem:[#allocation70_spill]] %s5293_s2 }
   0x2   :  { %12 = vsyncpa [#allocation3], 0 }
   0x3   :  { %14 = vsyncpa [#allocation3 + $0x1], 0 }
   0x4   :  { %15 = vsyncpa [#allocation6], 0 }
   0x5   :  { %17 = vsyncpa [#allocation6 + $0x1], 0 }
   0x6   :  { %18 = vsyncpa [#allocation4], 0 }
   0x7   :  { %19 = vsyncpa [#allocation10], 0  ;;  %s2931_s21 = smov 0   ;;  %s2933_s22 = smov 0  }
   0x8   :  { %s2935_s23 = smov 0   ;;  %s2937_s24 = smov 0  }
   0x9   :  { %s2939_s25 = smov 0   ;;  %s2941_s26 = smov 0  }
   0xa LB: > { %5417 = sst [smem:[#allocation16_spill]] %s2869_s23  ;;  %s2960_s27 = sadd.s32 4294967295, %s2881_s26   ;;  %s2881_s26 = sphi %s2941_s26, %s25_s26   ;;  %s2877_s25 = sphi %s2939_s25, %s5761_s25   ;;  %s2873_s24 = sphi %s2937_s24, %s5760_s24   ;;  %s2869_s23 = sphi %s2935_s23, %s5759_s23   ;;  %s2865_s22 = sphi %s2933_s22, %s5763_s22   ;;  %s2861_s21 = sphi %s2931_s21, %s5762_s21  }
   0xb   : > { %5418 = sst [smem:[#allocation17_spill]] %s2877_s25  ;;  %s34_s28 = sadd.s32 1, %s2877_s25 }
   0xc   : > { %5419 = sst [smem:[#allocation18_spill]] %s2881_s26  ;;  %p35_p0 = scmp.ge.s32.totalorder %s34_s28, 2 }
   0xd   : > { %s70_s29 = sadd.s32 1, %s2869_s23  ;;  %p77_p1 = scmp.ne.s32.totalorder %s2869_s23, %s2865_s22 }
   0xe   : > { %p78_p2 = scmp.eq.s32.totalorder %s2881_s26, 0  ;;  %s5765_s28 = smov (%p35_p0, %s34_s28), 0 }
   0xf   : > { %5420 = sst [smem:[#allocation19_spill]] %s5765_s28  ;;  %p83_p4 = scmp.ne.s32.totalorder %s2865_s22, %s2861_s21 }
  0x10   : > { %p79_p3 = por %p78_p2, %p77_p1  ;;  %s67_s30 = ssub.s32 %s2877_s25, %s5765_s28 }
  0x11   : > { %p84_p5 = scmp.eq.s32.totalorder %s2960_s27, 0  ;;  %p68_p6 = scmp.eq.s32.totalorder %s67_s30, 0 }
  0x12   : > { %p2444_p8 = scmp.lt.s32.totalorder %s2881_s26, 2  ;;  %s236_s9 = sand.u32 1, %s2869_s23  }
  0x13   : > { %p2973_p7 = por %p84_p5, %p83_p4  ;;  %s2983_s10 = sshll.u32 %s2877_s25, 7 }
  0x14   : > { %s2979_s8 = scalar_select %p68_p6, %s2869_s23, %s70_s29  }
  0x15   : > { %s2293_s11 = sshll.u32 %s236_s9, 7  ;;  %p2985_p9 = pnand %p2444_p8, %p79_p3 }
  0x16   : > { %5422 = sst [smem:[#allocation20_spill]] %s2979_s8  ;;  %s258_s13 = sand.u32 1, %s2881_s26  }
  0x17   : > { %s5424_s2 = sld [smem:[#allocation70_spill]]  ;;  %s262_s17 = scalar_lea.vmem [#allocation5], %s2293_s11 }
  0x18   : > { %s270_s18 = sshll.u32 %s262_s17, 4  ;;  %p2302_p10 = scmp.ge.s32.totalorder %s2881_s26, 1  ;;  %s271_s18 = int_to_ptr.vmem [resolvable:$true] %s270_s18 }
  0x19   : > { %s259_s20 = scalar_lea.sflag [#allocation6], %s258_s13  ;;  %s2883_s21 = smov 128  }
  0x1a   : > { %s2884_s29 = smov 8   ;;  %p300_p11 = scmp.lt.s32.totalorder %s2881_s26, 3 }
  0x1b   : > { %s240_s17 = scalar_lea.vmem [#allocation2], %s2293_s11  ;;  %s237_s13 = scalar_lea.sflag [#allocation3], %s236_s9 }
  0x1c   : > { %p2998_p12 = pnand %p2302_p10, %p300_p11  ;;  %s284_s8 = scalar_lea.vmem [#allocation7], %s2293_s11 }
  0x1d   : > { %s267_s16 = scalar_lea.hbm %s5424_s2, %s2983_s10  ;;  %s248_s2 = sshll.u32 %s240_s17, 4  ;;  %s249_s2 = int_to_ptr.vmem [resolvable:$true] %s248_s2 }
  0x1e   : > { %s268_s19 = sshll.u32 %s267_s16, 4  ;;  %s245_s16 = scalar_lea.hbm %s5292_s1, %s2983_s10  ;;  %s269_s19 = int_to_ptr.hbm [resolvable:$true] %s268_s19 }
  0x1f   : > { %2440 = dma.hbm_to_vmem [thread:$0]  (!%p2985_p9), %s269_s19, 2048, %s271_s18, %s259_s20, %s2883_s21, %s2883_s21, %s2884_s29  }
  0x20   : > { %s246_s28 = sshll.u32 %s245_s16, 4  ;;  %s289_s19 = scalar_lea.hbm %s5294_s3, %s2983_s10  ;;  %s247_s28 = int_to_ptr.hbm [resolvable:$true] %s246_s28 }
  0x21   : > { %2437 = dma.hbm_to_vmem [thread:$0]  (!%p2985_p9), %s247_s28, 2048, %s249_s2, %s237_s13, %s2883_s21, %s2883_s21, %s2884_s29  }
  0x22   : > { %s292_s23 = sshll.u32 %s284_s8, 4  ;;  %s290_s26 = sshll.u32 %s289_s19, 4  ;;  %s293_s23 = int_to_ptr.vmem [resolvable:$true] %s292_s23  ;;  %s291_s26 = int_to_ptr.hbm [resolvable:$true] %s290_s26 }
  0x23   : > { %2443 = dma.hbm_to_vmem [thread:$0]  (!%p2985_p9), %s291_s26, 2048, %s293_s23, %s259_s20, %s2883_s21, %s2883_s21, %s2884_s29  }
  0x24   : > { %304 = sbr.rel (%p2998_p12) target bundleno = 738 (0x2e2), region = 36 }
  0x29   : > { %s306_s14 = sand.u32 1, %s2865_s22  }
  0x2a   : > { %s3017_s9 = sshll.u32 %s306_s14, 7  ;;  %s307_s2 = scalar_lea.sflag [#allocation3], %s306_s14 }
  0x2b   : > { %s3020_s28 = scalar_lea.vmem [#allocation2], %s3017_s9 }
  0x2c   : > { %2844 = dma.done.wait (%p2973_p7), %s307_s2, 2048  }
  0x2d   : > { %2846 = vsyncadd (%p2973_p7), %s307_s2, 4294965248  ;;  %s316_s23 = sand.u32 1, %s2960_s27   ;;  %s3028_s26 = scalar_lea.vmem [#allocation5], %s3017_s9 }
  0x2e   : > { %s317_s25 = scalar_lea.sflag [#allocation6], %s316_s23 }
  0x2f   : > { %2848 = dma.done.wait (%p2973_p7), %s317_s25, 4096  }
  0x30   : > { %2850 = vsyncadd (%p2973_p7), %s317_s25, 4294963200  ;;  %v396_v0 = vld [vmem:[%s3028_s26] sm:$0xff]  ;;  %v397_v1 = vld [vmem:[%s3028_s26 + $0x8] sm:$0xff]  ;;  %s3051_s7 = scalar_lea.vmem [#allocation7], %s3017_s9  ;;  %p2306_p13 = scmp.ne.s32.totalorder %s2873_s24, 0 }
  0x31   : > { %v398_v2 = vld [vmem:[%s3028_s26 + $0x10] sm:$0xff]  ;;  %v399_v3 = vld [vmem:[%s3028_s26 + $0x18] sm:$0xff]  ;;  %v428_v4 = vmul.f32 1.442695, %v396_v0  ;;  %v400_v5 = vld [vmem:[%s3028_s26 + $0x20] sm:$0xff] }
  0x32   : > { %v430_v6 = vmul.f32 1.442695, %v397_v1  ;;  %v401_v7 = vld [vmem:[%s3028_s26 + $0x28] sm:$0xff]  ;;  %v432_v8 = vmul.f32 1.442695, %v398_v2  ;;  %v402_v9 = vld [vmem:[%s3028_s26 + $0x30] sm:$0xff] }
  0x33   : > { %2512 = vpow2.f32 %v428_v4  ;;  %v434_v10 = vmul.f32 1.442695, %v399_v3  ;;  %v403_v11 = vld [vmem:[%s3028_s26 + $0x38] sm:$0xff]  ;;  %v436_v12 = vmul.f32 1.442695, %v400_v5  ;;  %v404_v13 = vld [vmem:[%s3028_s26 + $0x40] sm:$0xff] }
  0x34   : > { %2514 = vpow2.f32 %v430_v6  ;;  %v438_v14 = vmul.f32 1.442695, %v401_v7  ;;  %v405_v15 = vld [vmem:[%s3028_s26 + $0x48] sm:$0xff]  ;;  %v440_v16 = vmul.f32 1.442695, %v402_v9  ;;  %v406_v17 = vld [vmem:[%s3028_s26 + $0x50] sm:$0xff] }
  0x35   : > { %2516 = vpow2.f32 %v432_v8  ;;  %v407_v18 = vld [vmem:[%s3028_s26 + $0x58] sm:$0xff]  ;;  %v408_v19 = vld [vmem:[%s3028_s26 + $0x60] sm:$0xff]  ;;  %v442_v20 = vmul.f32 1.442695, %v403_v11  ;;  %v409_v22 = vld [vmem:[%s3028_s26 + $0x68] sm:$0xff] }
  0x36   : > { %2518 = vpow2.f32 %v434_v10  ;;  %v444_v23 = vmul.f32 1.442695, %v404_v13  ;;  %v410_v25 = vld [vmem:[%s3028_s26 + $0x70] sm:$0xff]  ;;  %v411_v26 = vld [vmem:[%s3028_s26 + $0x78] sm:$0xff]  ;;  %v446_v27 = vmul.f32 1.442695, %v405_v15 }
  0x37   : > { %2520 = vpow2.f32 %v436_v12  ;;  %v448_v29 = vmul.f32 1.442695, %v406_v17  ;;  %v450_v30 = vmul.f32 1.442695, %v407_v18  ;;  %v452_v31 = vmul.f32 1.442695, %v408_v19 }
  0x38   : > { %2522 = vpow2.f32 %v438_v14  ;;  %v454_v33 = vmul.f32 1.442695, %v409_v22  ;;  %v456_v35 = vmul.f32 1.442695, %v410_v25  ;;  %v458_v37 = vmul.f32 1.442695, %v411_v26 }
  0x39   : > { %v2513_v21 = vpop.eup %2512  ;;  %2524 = vpow2.f32 %v440_v16  ;;  %v412_v59 = vld [vmem:[%s3051_s7] sm:$0xff]  ;;  %v413_v62 = vld [vmem:[%s3051_s7 + $0x8] sm:$0xff]  ;;  %v414_v3 = vld [vmem:[%s3051_s7 + $0x10] sm:$0xff] }
  0x3a   : > { %v2515_v24 = vpop.eup %2514  ;;  %2526 = vpow2.f32 %v442_v20  ;;  %v460_v39 = vadd.f32 1.0, %v2513_v21  ;;  %v3058_v2 = vld [vmem:[%s3020_s28] sm:$0xff]  ;;  %v3064_v8 = vld [vmem:[%s3020_s28 + $0x8] sm:$0xff]  ;;  %v415_v9 = vld [vmem:[%s3051_s7 + $0x18] sm:$0xff] }
  0x3b   : > { %v2517_v28 = vpop.eup %2516  ;;  %2528 = vpow2.f32 %v444_v23  ;;  %v461_v41 = vadd.f32 1.0, %v2515_v24  ;;  %5426 = vst [vmem:[#allocation21_spill] sm:$0xff] %v3058_v2  ;;  %v3071_v14 = vld [vmem:[%s3020_s28 + $0x10] sm:$0xff]  ;;  %v416_v15 = vld [vmem:[%s3051_s7 + $0x20] sm:$0xff]  ;;  %v3078_v20 = vld [vmem:[%s3020_s28 + $0x18] sm:$0xff] }
  0x3c   : > { %v2519_v32 = vpop.eup %2518  ;;  %2530 = vpow2.f32 %v446_v27  ;;  %v462_v43 = vadd.f32 1.0, %v2517_v28  ;;  %5427 = vst [vmem:[#allocation22_spill] sm:$0xff] %v3064_v8  ;;  %v417_v21 = vld [vmem:[%s3051_s7 + $0x28] sm:$0xff]  ;;  %v3088_v26 = vld [vmem:[%s3020_s28 + $0x20] sm:$0xff]  ;;  %v418_v27 = vld [vmem:[%s3051_s7 + $0x30] sm:$0xff] }
  0x3d   : > { %v2521_v34 = vpop.eup %2520  ;;  %2532 = vpow2.f32 %v448_v29  ;;  %v463_v45 = vadd.f32 1.0, %v2519_v32  ;;  %5428 = vst [vmem:[#allocation23_spill] sm:$0xff] %v3071_v14  ;;  %v3098_v32 = vld [vmem:[%s3020_s28 + $0x28] sm:$0xff] }
  0x3e   : > { %v2523_v36 = vpop.eup %2522  ;;  %2534 = vpow2.f32 %v450_v30  ;;  %v464_v47 = vadd.f32 1.0, %v2521_v34  ;;  %5430 = vst [vmem:[#allocation25_spill] sm:$0xff] %v3078_v20 }
  0x3f   : > { %v2525_v38 = vpop.eup %2524  ;;  %2536 = vpow2.f32 %v452_v31  ;;  %v465_v49 = vadd.f32 1.0, %v2523_v36  ;;  %5432 = vst [vmem:[#allocation27_spill] sm:$0xff] %v3088_v26 }
  0x40   : > { %v2527_v40 = vpop.eup %2526  ;;  %2538 = vpow2.f32 %v454_v33  ;;  %v466_v51 = vadd.f32 1.0, %v2525_v38  ;;  %5434 = vst [vmem:[#allocation29_spill] sm:$0xff] %v3098_v32  ;;  %v419_v33 = vld [vmem:[%s3051_s7 + $0x38] sm:$0xff]  ;;  %v3108_v38 = vld [vmem:[%s3020_s28 + $0x30] sm:$0xff] }
  0x41   : > { %v2529_v42 = vpop.eup %2528  ;;  %2540 = vpow2.f32 %v456_v35  ;;  %v467_v53 = vadd.f32 1.0, %v2527_v40  ;;  %5436 = vst [vmem:[#allocation31_spill] sm:$0xff] %v3108_v38 }
  0x42   : > { %v2531_v44 = vpop.eup %2530  ;;  %2542 = vpow2.f32 %v458_v37  ;;  %v468_v55 = vadd.f32 1.0, %v2529_v42 }
  0x43   : > { %v2533_v46 = vpop.eup %2532  ;;  %2544 = vlog2.f32 %v460_v39  ;;  %v469_v57 = vadd.f32 1.0, %v2531_v44  ;;  %v420_v39 = vld [vmem:[%s3051_s7 + $0x40] sm:$0xff]  ;;  %v3118_v44 = vld [vmem:[%s3020_s28 + $0x38] sm:$0xff] }
  0x44   : > { %v2535_v48 = vpop.eup %2534  ;;  %2546 = vlog2.f32 %v461_v41  ;;  %v470_v60 = vadd.f32 1.0, %v2533_v46  ;;  %5438 = vst [vmem:[#allocation33_spill] sm:$0xff] %v3118_v44 }
  0x45   : > { %v2537_v50 = vpop.eup %2536  ;;  %2548 = vlog2.f32 %v462_v43  ;;  %v471_v63 = vadd.f32 1.0, %v2535_v48 }
  0x46   : > { %v2539_v52 = vpop.eup %2538  ;;  %2550 = vlog2.f32 %v463_v45  ;;  %v472_v4 = vadd.f32 1.0, %v2537_v50  ;;  %v421_v45 = vld [vmem:[%s3051_s7 + $0x48] sm:$0xff]  ;;  %v3128_v50 = vld [vmem:[%s3020_s28 + $0x40] sm:$0xff] }
  0x47   : > { %v2541_v54 = vpop.eup %2540  ;;  %2552 = vlog2.f32 %v464_v47  ;;  %v473_v5 = vadd.f32 1.0, %v2539_v52  ;;  %5440 = vst [vmem:[#allocation35_spill] sm:$0xff] %v3128_v50 }
  0x48   : > { %v2543_v56 = vpop.eup %2542  ;;  %2554 = vlog2.f32 %v465_v49  ;;  %v474_v10 = vadd.f32 1.0, %v2541_v54 }
  0x49   : > { %v2545_v58 = vpop.eup %2544  ;;  %2556 = vlog2.f32 %v466_v51  ;;  %v475_v16 = vadd.f32 1.0, %v2543_v56  ;;  %v422_v51 = vld [vmem:[%s3051_s7 + $0x50] sm:$0xff]  ;;  %v3138_v56 = vld [vmem:[%s3020_s28 + $0x48] sm:$0xff] }
  0x4a   : > { %v2547_v61 = vpop.eup %2546  ;;  %v3055_v0 = vmul.f32 0.6931472, %v2545_v58  ;;  %2558 = vlog2.f32 %v467_v53  ;;  %5442 = vst [vmem:[#allocation37_spill] sm:$0xff] %v3138_v56 }
  0x4b   : > { %v2549_v1 = vpop.eup %2548  ;;  %v3061_v6 = vmul.f32 0.6931472, %v2547_v61  ;;  %2560 = vlog2.f32 %v468_v55 }
  0x4c   : > { %v2551_v7 = vpop.eup %2550  ;;  %v3067_v11 = vmul.f32 0.6931472, %v2549_v1  ;;  %2562 = vlog2.f32 %v469_v57  ;;  %v508_v12 = vmul.f32 %v3055_v0, %v412_v59  ;;  %v423_v57 = vld [vmem:[%s3051_s7 + $0x58] sm:$0xff] }
  0x4d   : > { %v2553_v13 = vpop.eup %2552  ;;  %v3074_v17 = vmul.f32 0.6931472, %v2551_v7  ;;  %2564 = vlog2.f32 %v470_v60  ;;  %v509_v18 = vmul.f32 %v3061_v6, %v413_v62  ;;  %v3148_v62 = vld [vmem:[%s3020_s28 + $0x50] sm:$0xff]  ;;  %v3158_v7 = vld [vmem:[%s3020_s28 + $0x58] sm:$0xff] }
  0x4e   : > { %v2555_v19 = vpop.eup %2554  ;;  %v3081_v22 = vmul.f32 0.6931472, %v2553_v13  ;;  %2566 = vlog2.f32 %v471_v63  ;;  %v510_v23 = vmul.f32 %v3067_v11, %v414_v3  ;;  %v3085_v24 = vadd.f32 %v508_v12, %v3058_v2  ;;  %5444 = vst [vmem:[#allocation39_spill] sm:$0xff] %v3148_v62  ;;  %v424_v63 = vld [vmem:[%s3051_s7 + $0x60] sm:$0xff] }
  0x4f   : > { %5429 = vst [vmem:[#allocation24_spill] sm:$0xff] %v3074_v17  ;;  %v2557_v25 = vpop.eup %2556  ;;  %v3091_v28 = vmul.f32 0.6931472, %v2555_v19  ;;  %2568 = vlog2.f32 %v472_v4  ;;  %v511_v29 = vmul.f32 %v3074_v17, %v415_v9  ;;  %v3095_v30 = vadd.f32 %v509_v18, %v3064_v8  ;;  %v425_v9 = vld [vmem:[%s3051_s7 + $0x68] sm:$0xff]  ;;  %v426_v18 = vld [vmem:[%s3051_s7 + $0x70] sm:$0xff] }
  0x50   : > { %5431 = vst [vmem:[#allocation26_spill] sm:$0xff] %v3081_v22  ;;  %v2559_v31 = vpop.eup %2558  ;;  %v3101_v34 = vmul.f32 0.6931472, %v2557_v25  ;;  %2570 = vlog2.f32 %v473_v5  ;;  %v512_v35 = vmul.f32 %v3081_v22, %v416_v15  ;;  %v3105_v36 = vadd.f32 %v510_v23, %v3071_v14 }
  0x51   : > { %5433 = vst [vmem:[#allocation28_spill] sm:$0xff] %v3091_v28  ;;  %v2561_v37 = vpop.eup %2560  ;;  %v3111_v40 = vmul.f32 0.6931472, %v2559_v31  ;;  %2572 = vlog2.f32 %v474_v10  ;;  %v513_v41 = vmul.f32 %v3091_v28, %v417_v21  ;;  %v3115_v42 = vadd.f32 %v511_v29, %v3078_v20  ;;  %v427_v29 = vld [vmem:[%s3051_s7 + $0x78] sm:$0xff] }
  0x52   : > { %5435 = vst [vmem:[#allocation30_spill] sm:$0xff] %v3101_v34  ;;  %v2563_v43 = vpop.eup %2562  ;;  %v3121_v46 = vmul.f32 0.6931472, %v2561_v37  ;;  %2574 = vlog2.f32 %v475_v16  ;;  %v514_v47 = vmul.f32 %v3101_v34, %v418_v27  ;;  %v3125_v48 = vadd.f32 %v512_v35, %v3088_v26  ;;  %v3168_v16 = vld [vmem:[%s3020_s28 + $0x60] sm:$0xff]  ;;  %v3178_v27 = vld [vmem:[%s3020_s28 + $0x68] sm:$0xff]  ;;  %v3188_v37 = vld [vmem:[%s3020_s28 + $0x70] sm:$0xff] }
  0x53   : > { %5437 = vst [vmem:[#allocation32_spill] sm:$0xff] %v3111_v40  ;;  %v2565_v49 = vpop.eup %2564  ;;  %v3131_v52 = vmul.f32 0.6931472, %v2563_v43  ;;  %v515_v53 = vmul.f32 %v3111_v40, %v419_v33  ;;  %v3135_v54 = vadd.f32 %v513_v41, %v3098_v32 }
  0x54   : > { %5439 = vst [vmem:[#allocation34_spill] sm:$0xff] %v3121_v46  ;;  %v2567_v55 = vpop.eup %2566  ;;  %v3141_v58 = vmul.f32 0.6931472, %v2565_v49  ;;  %v516_v59 = vmul.f32 %v3121_v46, %v420_v39  ;;  %v3145_v60 = vadd.f32 %v514_v47, %v3108_v38 }
  0x55   : > { %5441 = vst [vmem:[#allocation36_spill] sm:$0xff] %v3131_v52  ;;  %v2569_v61 = vpop.eup %2568  ;;  %v3151_v1 = vmul.f32 0.6931472, %v2567_v55  ;;  %v517_v3 = vmul.f32 %v3131_v52, %v421_v45  ;;  %v3155_v4 = vadd.f32 %v515_v53, %v3118_v44  ;;  %v3197_v45 = vld [vmem:[%s3020_s28 + $0x78] sm:$0xff] }
  0x56   : > { %5443 = vst [vmem:[#allocation38_spill] sm:$0xff] %v3141_v58  ;;  %v2571_v5 = vpop.eup %2570  ;;  %v3161_v10 = vmul.f32 0.6931472, %v2569_v61  ;;  %v518_v12 = vmul.f32 %v3141_v58, %v422_v51  ;;  %v3165_v13 = vadd.f32 %v516_v59, %v3128_v50 }
  0x57   : > { %5445 = vst [vmem:[#allocation40_spill] sm:$0xff] %v3151_v1  ;;  %v2573_v15 = vpop.eup %2572  ;;  %v3171_v19 = vmul.f32 0.6931472, %v2571_v5  ;;  %v519_v21 = vmul.f32 %v3151_v1, %v423_v57  ;;  %v3175_v23 = vadd.f32 %v517_v3, %v3138_v56 }
  0x58   : > { %5446 = vst [vmem:[#allocation41_spill] sm:$0xff] %v3158_v7  ;;  %v2575_v25 = vpop.eup %2574  ;;  %v3181_v31 = vmul.f32 0.6931472, %v2573_v15  ;;  %v520_v33 = vmul.f32 %v3161_v10, %v424_v63  ;;  %v3185_v35 = vadd.f32 %v518_v12, %v3148_v62 }
  0x59   : > { %5447 = vst [vmem:[#allocation42_spill] sm:$0xff] %v3161_v10  ;;  %v3190_v39 = vmul.f32 0.6931472, %v2575_v25  ;;  %v521_v41 = vmul.f32 %v3171_v19, %v425_v9  ;;  %v3194_v43 = vadd.f32 %v519_v21, %v3158_v7 }
  0x5a   : > { %5448 = vst [vmem:[#allocation43_spill] sm:$0xff] %v3168_v16  ;;  %v522_v47 = vmul.f32 %v3181_v31, %v426_v18  ;;  %v3201_v49 = vadd.f32 %v520_v33, %v3168_v16 }
  0x5b   : > { %5449 = vst [vmem:[#allocation44_spill] sm:$0xff] %v3171_v19  ;;  %v523_v51 = vmul.f32 %v3190_v39, %v427_v29  ;;  %v3205_v53 = vadd.f32 %v521_v41, %v3178_v27 }
  0x5c   : > { %5450 = vst [vmem:[#allocation45_spill] sm:$0xff] %v3178_v27  ;;  %v3208_v55 = vadd.f32 %v522_v47, %v3188_v37 }
  0x5d   : > { %5451 = vst [vmem:[#allocation46_spill] sm:$0xff] %v3181_v31  ;;  %v3211_v57 = vadd.f32 %v523_v51, %v3197_v45 }
  0x5e   : > { %5452 = vst [vmem:[#allocation47_spill] sm:$0xff] %v3188_v37 }
  0x5f   : > { %5453 = vst [vmem:[#allocation48_spill] sm:$0xff] %v3190_v39  ;;  %543 = sbr.rel (%p2306_p13) target bundleno = 117 (0x75), region = 52 }
  0x60   : > { %5454 = vst [vmem:[#allocation49_spill] sm:$0xff] %v3197_v45 }
  0x61   : > { %5455 = vst [vmem:[#allocation50_spill] sm:$0xff] %v3205_v53 }
  0x62   : > { %5456 = vst [vmem:[#allocation51_spill] sm:$0xff] %v3208_v55 }
  0x63   : > { %5457 = vst [vmem:[#allocation52_spill] sm:$0xff] %v3211_v57 }
  0x64   : > { %v2885_v59 = vmov 0.0  }
  0x65   : > { %544 = vst [vmem:[#allocation8] sm:$0xff] %v2885_v59 }
  0x66   : > { %545 = vst [vmem:[#allocation8 + $0x8] sm:$0xff] %v2885_v59 }
  0x67   : > { %546 = vst [vmem:[#allocation8 + $0x10] sm:$0xff] %v2885_v59 }
  0x68   : > { %547 = vst [vmem:[#allocation8 + $0x18] sm:$0xff] %v2885_v59 }
  0x69   : > { %548 = vst [vmem:[#allocation8 + $0x20] sm:$0xff] %v2885_v59 }
  0x6a   : > { %549 = vst [vmem:[#allocation8 + $0x28] sm:$0xff] %v2885_v59 }
  0x6b   : > { %550 = vst [vmem:[#allocation8 + $0x30] sm:$0xff] %v2885_v59 }
  0x6c   : > { %551 = vst [vmem:[#allocation8 + $0x38] sm:$0xff] %v2885_v59 }
  0x6d   : > { %552 = vst [vmem:[#allocation8 + $0x40] sm:$0xff] %v2885_v59 }
  0x6e   : > { %553 = vst [vmem:[#allocation8 + $0x48] sm:$0xff] %v2885_v59 }
  0x6f   : > { %554 = vst [vmem:[#allocation8 + $0x50] sm:$0xff] %v2885_v59 }
  0x70   : > { %555 = vst [vmem:[#allocation8 + $0x58] sm:$0xff] %v2885_v59 }
  0x71   : > { %556 = vst [vmem:[#allocation8 + $0x60] sm:$0xff] %v2885_v59 }
  0x72   : > { %557 = vst [vmem:[#allocation8 + $0x68] sm:$0xff] %v2885_v59 }
  0x73   : > { %558 = vst [vmem:[#allocation8 + $0x70] sm:$0xff] %v2885_v59 }
  0x74   : > { %559 = vst [vmem:[#allocation8 + $0x78] sm:$0xff] %v2885_v59 }
  0x75 PF: > { %v573_v61 = vld [vmem:[%s5291_s0 + $0x40] sm:$0xff]  ;;  %v2886_v3 = vmov 0   ;;  %v566_v5 = vld [vmem:[%s5291_s0 + $0x8] sm:$0xff]  ;;  %v575_v12 = vld [vmem:[%s5291_s0 + $0x50] sm:$0xff]  ;;  %v3235_v18 = vand.u32 4294901760, %v3211_v57  ;;  %v3238_v21 = vand.u32 4294901760, %v3208_v55 }
  0x76   : > { %v565_v63 = vld [vmem:[%s5291_s0] sm:$0xff]  ;;  %2577 = vset.pattern.permute.xlu1 %v2886_v3  ;;  %2576 = vset.pattern.permute.xlu0 %v2886_v3  ;;  %v574_v9 = vld [vmem:[%s5291_s0 + $0x48] sm:$0xff]  ;;  %v576_v15 = vld [vmem:[%s5291_s0 + $0x58] sm:$0xff]  ;;  %v3241_v25 = vand.u32 4294901760, %v3205_v53  ;;  %v3244_v29 = vand.u32 4294901760, %v3201_v49  ;;  %v3247_v33 = vand.u32 4294901760, %v3194_v43 }
  0x77   : > { %606 = vperm.xlu0 %2576, %v573_v61   ;;  %582 = vperm.xlu1 %2577, %v565_v63   ;;  %v3250_v41 = vand.u32 4294901760, %v3185_v35  ;;  %v3254_v47 = vsub.f32 %v3211_v57, %v3235_v18  ;;  %v3258_v51 = vsub.f32 %v3208_v55, %v3238_v21  ;;  %v568_v1 = vld [vmem:[%s5291_s0 + $0x18] sm:$0xff]  ;;  %v3388_v37 = vand.u32 4294901760, %v3135_v54  ;;  %s2307_s17 = sshll.u32 %s2873_s24, 7 }
  0x78   : > { %2578 = vset.pattern.permute.xlu2 %v2886_v3  ;;  %v3262_v59 = vsub.f32 %v3205_v53, %v3241_v25  ;;  %v3266_v61 = vsub.f32 %v3201_v49, %v3244_v29  ;;  %v3270_v63 = vsub.f32 %v3194_v43, %v3247_v33  ;;  %694 = vmatpush.msra.mxu0 %v3235_v18  ;;  %v3395_v16 = vand.u32 4294901760, %v3125_v48 }
  0x79   : > { %585 = vperm.xlu2 %2578, %v566_v5   ;;  %2384 = vmatpush.msra.mxu2 %v3235_v18  ;;  %v5314_v3 = vand.u32 4294901760, %v3254_v47  ;;  %v5317_v5 = vand.u32 4294901760, %v3258_v51  ;;  %v3286_v31 = vsub.f32 %v3185_v35, %v3250_v41  ;;  %v3399_v40 = vsub.f32 %v3135_v54, %v3388_v37 }
  0x7a   : > { %696 = vmatpush.msra.mxu0 %v3238_v21  ;;  %v5458_v10 = vand.u32 4294901760, %v3262_v59  ;;  %v5460_v46 = vand.u32 4294901760, %v3270_v63  ;;  %v3411_v7 = vand.u32 4294901760, %v3115_v42  ;;  %v3422_v56 = vand.u32 4294901760, %v3105_v36 }
  0x7b   : > { %2385 = vmatpush.msra.mxu2 %v3238_v21  ;;  %v863_v19 = vsub.f32 %v3258_v51, %v5317_v5  ;;  %v5459_v5 = vand.u32 4294901760, %v3266_v61  ;;  %v5337_v62 = vand.u32 4294901760, %v3399_v40  ;;  %v3438_v38 = vand.u32 4294901760, %v3095_v30 }
  0x7c   : > { %v869_v39 = vsub.f32 %v3262_v59, %v5458_v10  ;;  %698 = vmatpush.msra.mxu0 %v3241_v25  ;;  %v5322_v10 = vand.u32 4294901760, %v3286_v31  ;;  %v3435_v44 = vsub.f32 %v3105_v36, %v3422_v56  ;;  %v3451_v20 = vand.u32 4294901760, %v3085_v24 }
  0x7d   : > { %2386 = vmatpush.msra.mxu2 %v3241_v25  ;;  %v864_v52 = vand.u32 4294901760, %v863_v19  ;;  %v875_v45 = vsub.f32 %v3266_v61, %v5459_v5  ;;  %v578_v19 = vld [vmem:[%s5291_s0 + $0x68] sm:$0xff]  ;;  %v917_v50 = vsub.f32 %v3399_v40, %v5337_v62  ;;  %v3448_v26 = vsub.f32 %v3095_v30, %v3438_v38 }
  0x7e   : > { %700 = vmatpush.msra.mxu0 %v3244_v29  ;;  %v870_v58 = vand.u32 4294901760, %v869_v39  ;;  %v5479_v28 = vmov 1.0  }
  0x7f   : > { %609 = vperm.xlu0 %2576, %v574_v9   ;;  %612 = vperm.xlu1 %2577, %v575_v12   ;;  %v567_v12 = vld [vmem:[%s5291_s0 + $0x10] sm:$0xff]  ;;  %v857_v9 = vsub.f32 %v3254_v47, %v5314_v3  ;;  %v876_v39 = vand.u32 4294901760, %v875_v45  ;;  %v570_v45 = vld [vmem:[%s5291_s0 + $0x28] sm:$0xff]  ;;  %v918_v62 = vand.u32 4294901760, %v917_v50  ;;  %v5347_v14 = vand.u32 4294901760, %v3448_v26 }
  0x80   : > { %2387 = vmatpush.msra.mxu2 %v3244_v29  ;;  %702 = vmatpush.msra.mxu0 %v3247_v33 }
  0x81   : > { %615 = vperm.xlu2 %2578, %v576_v15   ;;  %v577_v15 = vld [vmem:[%s5291_s0 + $0x60] sm:$0xff]  ;;  %v858_v3 = vand.u32 4294901760, %v857_v9  ;;  %v580_v9 = vld [vmem:[%s5291_s0 + $0x78] sm:$0xff] }
  0x82   : > { %2388 = vmatpush.msra.mxu2 %v3247_v33  ;;  %704 = vmatpush.msra.mxu0 %v3250_v41 }
  0x83   : > { %859 = vmatpush.msra.mxu1 %v858_v3  ;;  %2400 = vmatpush.msra.mxu3 %v858_v3  ;;  %v887_v3 = vsub.f32 %v3286_v31, %v5322_v10 }
  0x84   : > { %2389 = vmatpush.msra.mxu2 %v3250_v41 }
  0x85   : > { %865 = vmatpush.msra.mxu1 %v864_v52  ;;  %2401 = vmatpush.msra.mxu3 %v864_v52  ;;  %v888_v52 = vand.u32 4294901760, %v887_v3 }
  0x87   : > { %588 = vperm.xlu0 %2576, %v567_v12   ;;  %618 = vperm.xlu1 %2577, %v577_v15   ;;  %v881_v12 = vsub.f32 %v3270_v63, %v5460_v46  ;;  %v579_v46 = vld [vmem:[%s5291_s0 + $0x70] sm:$0xff]  ;;  %v572_v15 = vld [vmem:[%s5291_s0 + $0x38] sm:$0xff] }
  0x88   : > { %871 = vmatpush.msra.mxu1 %v870_v58  ;;  %2402 = vmatpush.msra.mxu3 %v870_v58  ;;  %v571_v58 = vld [vmem:[%s5291_s0 + $0x30] sm:$0xff] }
  0x89   : > { %591 = vperm.xlu2 %2578, %v568_v1   ;;  %v569_v1 = vld [vmem:[%s5291_s0 + $0x20] sm:$0xff]  ;;  %v882_v5 = vand.u32 4294901760, %v881_v12  ;;  %v3343_v12 = vand.u32 4294901760, %v3175_v23 }
  0x8a   : > { %877 = vmatpush.msra.mxu1 %v876_v39  ;;  %2403 = vmatpush.msra.mxu3 %v876_v39 }
  0x8b   : > { %706 = vmatpush.msra.mxu0 %v3343_v12  ;;  %2390 = vmatpush.msra.mxu2 %v3343_v12 }
  0x8c   : > { %883 = vmatpush.msra.mxu1 %v882_v5  ;;  %2404 = vmatpush.msra.mxu3 %v882_v5 }
  0x8e   : > { %889 = vmatpush.msra.mxu1 %v888_v52  ;;  %2405 = vmatpush.msra.mxu3 %v888_v52 }
  0x8f   : > { %621 = vperm.xlu0 %2576, %v578_v19   ;;  %594 = vperm.xlu1 %2577, %v569_v1   ;;  %v3347_v19 = vsub.f32 %v3175_v23, %v3343_v12  ;;  %v3350_v1 = vand.u32 4294901760, %v3165_v13 }
  0x91   : > { %624 = vperm.xlu2 %2578, %v579_v46   ;;  %v5321_v39 = vand.u32 4294901760, %v3347_v19  ;;  %v3357_v3 = vsub.f32 %v3165_v13, %v3350_v1  ;;  %v3360_v46 = vand.u32 4294901760, %v3155_v4  ;;  %708 = vmatpush.msra.mxu0 %v3350_v1 }
  0x92   : > { %2391 = vmatpush.msra.mxu2 %v3350_v1 }
  0x93   : > { %v893_v5 = vsub.f32 %v3347_v19, %v5321_v39  ;;  %v5324_v52 = vand.u32 4294901760, %v3357_v3  ;;  %710 = vmatpush.msra.mxu0 %v3360_v46 }
  0x94   : > { %2392 = vmatpush.msra.mxu2 %v3360_v46 }
  0x97   : > { %597 = vperm.xlu0 %2576, %v570_v45   ;;  %627 = vperm.xlu1 %2577, %v580_v9   ;;  %v3370_v45 = vsub.f32 %v3155_v4, %v3360_v46  ;;  %v3373_v9 = vand.u32 4294901760, %v3145_v60 }
  0x99   : > { %600 = vperm.xlu2 %2578, %v571_v58   ;;  %v894_v58 = vand.u32 4294901760, %v893_v5  ;;  %v5329_v39 = vand.u32 4294901760, %v3370_v45  ;;  %v3383_v10 = vsub.f32 %v3145_v60, %v3373_v9  ;;  %712 = vmatpush.msra.mxu0 %v3373_v9 }
  0x9a   : > { %2393 = vmatpush.msra.mxu2 %v3373_v9 }
  0x9b   : > { %895 = vmatpush.msra.mxu1 %v894_v58  ;;  %2406 = vmatpush.msra.mxu3 %v894_v58  ;;  %v5332_v27 = vand.u32 4294901760, %v3383_v10 }
  0x9c   : > { %714 = vmatpush.msra.mxu0 %v3388_v37  ;;  %2394 = vmatpush.msra.mxu2 %v3388_v37 }
  0x9e   : > { %716 = vmatpush.msra.mxu0 %v3395_v16  ;;  %2395 = vmatpush.msra.mxu2 %v3395_v16 }
  0x9f   : > { %603 = vperm.xlu0 %2576, %v572_v15   ;;  %v899_v15 = vsub.f32 %v3357_v3, %v5324_v52  ;;  %v905_v52 = vsub.f32 %v3370_v45, %v5329_v39  ;;  %v3408_v39 = vsub.f32 %v3125_v48, %v3395_v16 }
  0xa0   : > { %718 = vmatpush.msra.mxu0 %v3411_v7  ;;  %2396 = vmatpush.msra.mxu2 %v3411_v7 }
  0xa1   : > { %v900_v5 = vand.u32 4294901760, %v899_v15  ;;  %v906_v58 = vand.u32 4294901760, %v905_v52  ;;  %v911_v15 = vsub.f32 %v3383_v10, %v5332_v27  ;;  %v3419_v27 = vsub.f32 %v3115_v42, %v3411_v7 }
  0xa2   : > { %720 = vmatpush.msra.mxu0 %v3422_v56  ;;  %2397 = vmatpush.msra.mxu2 %v3422_v56 }
  0xa3   : > { %901 = vmatpush.msra.mxu1 %v900_v5  ;;  %2407 = vmatpush.msra.mxu3 %v900_v5  ;;  %v912_v52 = vand.u32 4294901760, %v911_v15  ;;  %v5339_v5 = vand.u32 4294901760, %v3408_v39  ;;  %v5343_v15 = vand.u32 4294901760, %v3419_v27 }
  0xa4   : > { %722 = vmatpush.msra.mxu0 %v3438_v38  ;;  %2398 = vmatpush.msra.mxu2 %v3438_v38 }
  0xa5   : > { %907 = vmatpush.msra.mxu1 %v906_v58  ;;  %2408 = vmatpush.msra.mxu3 %v906_v58  ;;  %v923_v58 = vsub.f32 %v3408_v39, %v5339_v5  ;;  %v5344_v5 = vand.u32 4294901760, %v3435_v44 }
  0xa6   : > { %724 = vmatpush.msra.mxu0 %v3451_v20  ;;  %2399 = vmatpush.msra.mxu2 %v3451_v20 }
  0xa7   : > { %913 = vmatpush.msra.mxu1 %v912_v52  ;;  %2409 = vmatpush.msra.mxu3 %v912_v52  ;;  %v924_v32 = vand.u32 4294901760, %v923_v58  ;;  %v929_v52 = vsub.f32 %v3419_v27, %v5343_v15  ;;  %v935_v58 = vsub.f32 %v3435_v44, %v5344_v5  ;;  %v3461_v15 = vsub.f32 %v3085_v24, %v3451_v20 }
  0xa8   : > { %1017 = vmatpush.msrb.mxu2 %v3254_v47 }
  0xa9   : > { %919 = vmatpush.msra.mxu1 %v918_v62  ;;  %2410 = vmatpush.msra.mxu3 %v918_v62  ;;  %v930_v50 = vand.u32 4294901760, %v929_v52  ;;  %v936_v62 = vand.u32 4294901760, %v935_v58  ;;  %v941_v52 = vsub.f32 %v3448_v26, %v5347_v14  ;;  %v946_v5 = vand.u32 4294901760, %v3461_v15 }
  0xaa   : > { %1020 = vmatpush.msrb.mxu2 %v3258_v51  ;;  %v5462_v14 = vand.u32 4294901760, %v3258_v51 }
  0xab   : > { %925 = vmatpush.msra.mxu1 %v924_v32  ;;  %2411 = vmatpush.msra.mxu3 %v924_v32  ;;  %v942_v34 = vand.u32 4294901760, %v941_v52  ;;  %v5461_v32 = vand.u32 4294901760, %v3254_v47  ;;  %v947_v58 = vsub.f32 %v3461_v15, %v946_v5  ;;  %v5463_v52 = vand.u32 4294901760, %v3262_v59 }
  0xac   : > { %1023 = vmatpush.msrb.mxu2 %v3262_v59  ;;  %v5464_v47 = vand.u32 4294901760, %v3266_v61  ;;  %v3537_v59 = vstv %s2307_s17 }
  0xad   : > { %931 = vmatpush.msra.mxu1 %v930_v50  ;;  %2412 = vmatpush.msra.mxu3 %v930_v50  ;;  %v948_v50 = vand.u32 4294901760, %v947_v58 }
  0xae   : > { %1276 = vmatpush.msrb.mxu0 %v5461_v32  ;;  %1026 = vmatpush.msrb.mxu2 %v3266_v61  ;;  %v5475_v61 = vand.u32 4294901760, %v3435_v44 }
  0xaf   : > { %937 = vmatpush.msra.mxu1 %v936_v62  ;;  %2413 = vmatpush.msra.mxu3 %v936_v62 }
  0xb0   : > { %1280 = vmatpush.msrb.mxu0 %v5462_v14  ;;  %1029 = vmatpush.msrb.mxu2 %v3270_v63  ;;  %v5465_v14 = vand.u32 4294901760, %v3270_v63  ;;  %v5476_v63 = vand.u32 4294901760, %v3448_v26 }
  0xb1   : > { %943 = vmatpush.msra.mxu1 %v942_v34  ;;  %2414 = vmatpush.msra.mxu3 %v942_v34  ;;  %v5466_v34 = vand.u32 4294901760, %v3286_v31 }
  0xb2   : > { %1284 = vmatpush.msrb.mxu0 %v5463_v52  ;;  %1032 = vmatpush.msrb.mxu2 %v3286_v31  ;;  %v5469_v31 = vand.u32 4294901760, %v3370_v45 }
  0xb3   : > { %949 = vmatpush.msra.mxu1 %v948_v50  ;;  %2415 = vmatpush.msra.mxu3 %v948_v50 }
  0xb4   : > { %1288 = vmatpush.msrb.mxu0 %v5464_v47  ;;  %1035 = vmatpush.msrb.mxu2 %v3347_v19 }
  0xb5   : > { %1145 = vmatpush.msrb.mxu3 %v3235_v18  ;;  %1403 = vmatpush.msrb.mxu1 %v3235_v18  ;;  %v5467_v18 = vand.u32 4294901760, %v3347_v19 }
  0xb6   : > { %1292 = vmatpush.msrb.mxu0 %v5465_v14  ;;  %1038 = vmatpush.msrb.mxu2 %v3357_v3 }
  0xb7   : > { %1147 = vmatpush.msrb.mxu3 %v3238_v21  ;;  %1405 = vmatpush.msrb.mxu1 %v3238_v21  ;;  %v5468_v21 = vand.u32 4294901760, %v3357_v3 }
  0xb8   : > { %1296 = vmatpush.msrb.mxu0 %v5466_v34  ;;  %1041 = vmatpush.msrb.mxu2 %v3370_v45 }
  0xb9   : > { %1149 = vmatpush.msrb.mxu3 %v3241_v25  ;;  %1407 = vmatpush.msrb.mxu1 %v3241_v25  ;;  %v5470_v25 = vand.u32 4294901760, %v3383_v10 }
  0xba   : > { %1300 = vmatpush.msrb.mxu0 %v5467_v18  ;;  %1044 = vmatpush.msrb.mxu2 %v3383_v10 }
  0xbb   : > { %1151 = vmatpush.msrb.mxu3 %v3244_v29  ;;  %1409 = vmatpush.msrb.mxu1 %v3244_v29  ;;  %v5471_v29 = vand.u32 4294901760, %v3399_v40 }
  0xbc   : > { %1304 = vmatpush.msrb.mxu0 %v5468_v21  ;;  %1047 = vmatpush.msrb.mxu2 %v3399_v40  ;;  %v5473_v40 = vand.u32 4294901760, %v3419_v27 }
  0xbd   : > { %1153 = vmatpush.msrb.mxu3 %v3247_v33  ;;  %1411 = vmatpush.msrb.mxu1 %v3247_v33  ;;  %v5348_v33 = vlaneseq }
  0xbe   : > { %1308 = vmatpush.msrb.mxu0 %v5469_v31  ;;  %1050 = vmatpush.msrb.mxu2 %v3408_v39 }
  0xbf   : > { %1155 = vmatpush.msrb.mxu3 %v3250_v41  ;;  %1413 = vmatpush.msrb.mxu1 %v3250_v41  ;;  %v5472_v41 = vand.u32 4294901760, %v3408_v39  ;;  %v3533_v51 = vand.u32 127, %v5348_v33 }
  0xc0   : > { %1312 = vmatpush.msrb.mxu0 %v5470_v25  ;;  %1053 = vmatpush.msrb.mxu2 %v3419_v27 }
  0xc1   : > { %1157 = vmatpush.msrb.mxu3 %v3343_v12  ;;  %1415 = vmatpush.msrb.mxu1 %v3343_v12  ;;  %5474 = vst [vmem:[#allocation53_spill] sm:$0xff] %v3533_v51  ;;  %v3551_v10 = vadd.s32 %v3537_v59, %v3533_v51  ;;  %v5364_v12 = vmov 1.0  }
  0xc2   : > { %1316 = vmatpush.msrb.mxu0 %v5471_v29  ;;  %1056 = vmatpush.msrb.mxu2 %v3435_v44 }
  0xc3   : > { %1159 = vmatpush.msrb.mxu3 %v3350_v1  ;;  %1417 = vmatpush.msrb.mxu1 %v3350_v1 }
  0xc4   : > { %1320 = vmatpush.msrb.mxu0 %v5472_v41  ;;  %1059 = vmatpush.msrb.mxu2 %v3448_v26  ;;  %v5359_v26 = vmov 0.0  }
  0xc5   : > { %1161 = vmatpush.msrb.mxu3 %v3360_v46  ;;  %1419 = vmatpush.msrb.mxu1 %v3360_v46 }
  0xc6   : > { %1324 = vmatpush.msrb.mxu0 %v5473_v40  ;;  %1062 = vmatpush.msrb.mxu2 %v3461_v15 }
  0xc7   : > { %1163 = vmatpush.msrb.mxu3 %v3373_v9  ;;  %1421 = vmatpush.msrb.mxu1 %v3373_v9 }
  0xc8   : > { %1328 = vmatpush.msrb.mxu0 %v5475_v61 }
  0xc9   : > { %1165 = vmatpush.msrb.mxu3 %v3388_v37  ;;  %1423 = vmatpush.msrb.mxu1 %v3388_v37 }
  0xca   : > { %1332 = vmatpush.msrb.mxu0 %v5476_v63 }
  0xcb   : > { %1167 = vmatpush.msrb.mxu3 %v3395_v16  ;;  %1425 = vmatpush.msrb.mxu1 %v3395_v16 }
  0xcc   : > { %1336 = vmatpush.msrb.mxu0 %v946_v5 }
  0xcd   : > { %1169 = vmatpush.msrb.mxu3 %v3411_v7  ;;  %1427 = vmatpush.msrb.mxu1 %v3411_v7 }
  0xcf   : > { %1171 = vmatpush.msrb.mxu3 %v3422_v56  ;;  %1429 = vmatpush.msrb.mxu1 %v3422_v56 }
  0xd1   : > { %1173 = vmatpush.msrb.mxu3 %v3438_v38  ;;  %1431 = vmatpush.msrb.mxu1 %v3438_v38 }
  0xd3   : > { %v3544_v27 = vpop.permute.xlu2 %585  ;;  %1175 = vmatpush.msrb.mxu3 %v3451_v20  ;;  %1433 = vmatpush.msrb.mxu1 %v3451_v20 }
  0xd4   : > { %vm630_vm0 = vcmp.eq.s32.totalorder %v3544_v27, %v3551_v10 }
  0xd5   : > { %v2309_v44 = vsel %vm630_vm0, 1.0, %v5359_v26 }
  0xd6   : > { %v3593_v38 = vsub.f32 %v2309_v44, %v2309_v44 }
  0xd8   : > { %v5355_v5 = vand.u32 4294901760, %v3593_v38 }
  0xda   : > { %v736_v47 = vsub.f32 %v3593_v38, %v5355_v5 }
  0xdb   : > { %v3600_v39 = vpop.permute.xlu2 %615 }
  0xdc   : > { %vm640_vm5 = vcmp.eq.s32.totalorder %v3600_v39, %v3551_v10  ;;  %v737_v21 = vand.u32 4294901760, %v736_v47 }
  0xdd   : > { %v2319_v41 = vsel %vm640_vm5, 1.0, %v5359_v26 }
  0xe3   : > { %v3645_v18 = vpop.permute.xlu2 %591 }
  0xe4   : > { %vm632_vm6 = vcmp.eq.s32.totalorder %v3645_v18, %v3551_v10 }
  0xe5   : > { %v2311_v63 = vsel %vm632_vm6, 1.0, %v5359_v26 }
  0xe9   : > { %v3567_v16 = vpop.permute.xlu0 %606  ;;  %v3569_v7 = vpop.permute.xlu1 %582 }
  0xea   : > { %vm637_vm1 = vcmp.eq.s32.totalorder %v3567_v16, %v3551_v10  ;;  %vm629_vm2 = vcmp.eq.s32.totalorder %v3569_v7, %v3551_v10 }
  0xeb   : > { %v2316_v56 = vsel %vm637_vm1, 1.0, %v5359_v26  ;;  %v2308_v37 = vsel %vm629_vm2, 1.0, %v5359_v26  ;;  %2324 = vmatmul.msk.f32.vlgmr.msra.gmra.mxu1 %vm629_vm2, %v5364_v12  ;;  %2332 = vmatmul.msk.f32.vlgmr.msra.gmra.mxu3 %vm637_vm1, %v5364_v12 }
  0xec   : > { %v3595_v19 = vsub.f32 %v2316_v56, %v2316_v56  ;;  %v3597_v1 = vsub.f32 %v2308_v37, %v2308_v37  ;;  %v3681_v37 = vsub.f32 %v2319_v41, %v2319_v41 }
  0xee   : > { %v5358_v3 = vand.u32 4294901760, %v3597_v1  ;;  %v5351_v46 = vand.u32 4294901760, %v3595_v19  ;;  %v5352_v47 = vand.u32 4294901760, %v3681_v37  ;;  %v5486_v27 = vand.u32 4294901760, %v3595_v19 }
  0xf0   : > { %v728_v45 = vsub.f32 %v3597_v1, %v5358_v3  ;;  %v792_v9 = vsub.f32 %v3595_v19, %v5351_v46 }
  0xf1   : > { %v3611_v15 = vpop.permute.xlu0 %609  ;;  %v3613_v62 = vpop.permute.xlu1 %612 }
  0xf2   : > { %vm638_vm3 = vcmp.eq.s32.totalorder %v3611_v15, %v3551_v10  ;;  %vm639_vm4 = vcmp.eq.s32.totalorder %v3613_v62, %v3551_v10  ;;  %v729_v20 = vand.u32 4294901760, %v728_v45  ;;  %v793_v32 = vand.u32 4294901760, %v792_v9 }
  0xf3   : > { %v2317_v58 = vsel %vm638_vm3, 1.0, %v5359_v26  ;;  %v2318_v50 = vsel %vm639_vm4, 1.0, %v5359_v26  ;;  %2325 = vmatmul.msk.f32.gmra.mxu1 %vm630_vm0, %v5364_v12  ;;  %2333 = vmatmul.msk.f32.gmra.mxu3 %vm638_vm3, %v5364_v12  ;;  %v3683_v45 = vsub.f32 %v2311_v63, %v2311_v63 }
  0xf4   : > { %v3635_v52 = vsub.f32 %v2317_v58, %v2317_v58  ;;  %730 = vmatmul.f32.vlgmr.msra.gmra.mxu0 %v729_v20  ;;  %794 = vmatmul.f32.vlgmr.msra.gmra.mxu2 %v793_v32  ;;  %v3640_v14 = vsub.f32 %v2318_v50, %v2318_v50 }
  0xf5   : > { %v5353_v41 = vand.u32 4294901760, %v3683_v45 }
  0xf6   : > { %v5350_v34 = vand.u32 4294901760, %v3635_v52  ;;  %v5349_v61 = vand.u32 4294901760, %v3640_v14 }
  0xf8   : > { %v800_v31 = vsub.f32 %v3635_v52, %v5350_v34  ;;  %v808_v20 = vsub.f32 %v3640_v14, %v5349_v61  ;;  %v752_v61 = vsub.f32 %v3683_v45, %v5353_v41 }
  0xf9   : > { %v3652_v25 = vpop.permute.xlu0 %588  ;;  %v3654_v29 = vpop.permute.xlu1 %618 }
  0xfa   : > { %vm631_vm7 = vcmp.eq.s32.totalorder %v3652_v25, %v3551_v10  ;;  %v801_v40 = vand.u32 4294901760, %v800_v31  ;;  %vm641_vm8 = vcmp.eq.s32.totalorder %v3654_v29, %v3551_v10  ;;  %v809_v31 = vand.u32 4294901760, %v808_v20 }
  0xfb   : > { %v2310_v44 = vsel %vm631_vm7, 1.0, %v5359_v26  ;;  %2326 = vmatmul.msk.f32.gmra.mxu1 %vm631_vm7, %v5364_v12  ;;  %2334 = vmatmul.msk.f32.gmra.mxu3 %vm639_vm4, %v5364_v12  ;;  %v2320_v63 = vsel %vm641_vm8, 1.0, %v5359_v26  ;;  %v816_v20 = vsub.f32 %v3681_v37, %v5352_v47 }
  0xfc   : > { %v3679_v56 = vsub.f32 %v2310_v44, %v2310_v44  ;;  %738 = vmatmul.f32.gmra.mxu0 %v737_v21  ;;  %802 = vmatmul.f32.gmra.mxu2 %v801_v40  ;;  %v3702_v40 = vpop.permute.xlu2 %624 }
  0xfd   : > { %v817_v46 = vand.u32 4294901760, %v816_v20  ;;  %vm643_vm12 = vcmp.eq.s32.totalorder %v3702_v40, %v3551_v10 }
  0xfe   : > { %v5354_v9 = vand.u32 4294901760, %v3679_v56 }
 0x100   : > { %v744_v32 = vsub.f32 %v3679_v56, %v5354_v9 }
 0x101   : > { %v3694_v58 = vpop.permute.xlu0 %621  ;;  %v3696_v50 = vpop.permute.xlu1 %594 }
 0x102   : > { %vm633_vm9 = vcmp.eq.s32.totalorder %v3696_v50, %v3551_v10  ;;  %v745_v21 = vand.u32 4294901760, %v744_v32  ;;  %v3723_v32 = vsub.f32 %v2320_v63, %v2320_v63  ;;  %vm642_vm10 = vcmp.eq.s32.totalorder %v3694_v58, %v3551_v10 }
 0x103   : > { %v2312_v44 = vsel %vm633_vm9, 1.0, %v5359_v26  ;;  %2327 = vmatmul.msk.f32.gmra.mxu1 %vm632_vm6, %v5364_v12  ;;  %2335 = vmatmul.msk.f32.gmra.mxu3 %vm640_vm5, %v5364_v12 }
 0x104   : > { %746 = vmatmul.f32.gmra.mxu0 %v745_v21  ;;  %810 = vmatmul.f32.gmra.mxu2 %v809_v31  ;;  %v3725_v33 = vsub.f32 %v2312_v44, %v2312_v44  ;;  %v753_v21 = vand.u32 4294901760, %v752_v61  ;;  %v5357_v63 = vand.u32 4294901760, %v3723_v32  ;;  %v2321_v44 = vsel %vm642_vm10, 1.0, %v5359_v26  ;;  %v3754_v61 = vpop.permute.xlu2 %600 }
 0x105   : > { %v3756_v20 = vsub.f32 %v2321_v44, %v2321_v44  ;;  %vm635_vm13 = vcmp.eq.s32.totalorder %v3754_v61, %v3551_v10 }
 0x106   : > { %v5356_v31 = vand.u32 4294901760, %v3725_v33  ;;  %v824_v5 = vsub.f32 %v3723_v32, %v5357_v63  ;;  %v2314_v63 = vsel %vm635_vm13, 1.0, %v5359_v26  ;;  %v5485_v7 = vand.u32 4294901760, %v3725_v33 }
 0x107   : > { %v5477_v51 = vand.u32 4294901760, %v3756_v20 }
 0x108   : > { %v760_v9 = vsub.f32 %v3725_v33, %v5356_v31  ;;  %v2322_v31 = vsel %vm643_vm12, 1.0, %v5359_v26 }
 0x109   : > { %v3732_v34 = vpop.permute.xlu0 %597  ;;  %v3792_v3 = vsub.f32 %v2322_v31, %v2322_v31  ;;  %v832_v8 = vsub.f32 %v3756_v20, %v5477_v51  ;;  %v5478_v31 = vmov 0.0  }
 0x10a   : > { %vm634_vm11 = vcmp.eq.s32.totalorder %v3732_v34, %v3551_v10  ;;  %v5487_v34 = vand.u32 4294901760, %v3635_v52 }
 0x10b   : > { %v2313_v47 = vsel %vm634_vm11, 1.0, %v5359_v26  ;;  %2328 = vmatmul.msk.f32.gmra.mxu1 %vm633_vm9, %v5364_v12  ;;  %2336 = vmatmul.msk.f32.gmra.mxu3 %vm641_vm8, %v5364_v12  ;;  %v5480_v57 = vand.u32 4294901760, %v3792_v3 }
 0x10c   : > { %754 = vmatmul.f32.gmra.mxu0 %v753_v21  ;;  %818 = vmatmul.f32.gmra.mxu2 %v817_v46  ;;  %v3758_v41 = vsub.f32 %v2313_v47, %v2313_v47  ;;  %v761_v46 = vand.u32 4294901760, %v760_v9  ;;  %v825_v21 = vand.u32 4294901760, %v824_v5  ;;  %v3788_v5 = vpop.permute.xlu1 %627  ;;  %v774_v47 = vsub.f32 %v2314_v63, %v2314_v63 }
 0x10d   : > { %vm644_vm14 = vcmp.eq.s32.totalorder %v3788_v5, %v3551_v10 }
 0x10e   : > { %v767_v44 = vand.u32 4294901760, %v3758_v41  ;;  %v2323_v63 = vsel %vm644_vm14, 1.0, %v5478_v31 }
 0x110   : > { %v768_v26 = vsub.f32 %v3758_v41, %v767_v44 }
 0x111   : > { %v3790_v9 = vpop.permute.xlu0 %603 }
 0x112   : > { %vm636_vm15 = vcmp.eq.s32.totalorder %v3790_v9, %v3551_v10  ;;  %v5489_v9 = vand.u32 4294901760, %v3681_v37 }
 0x113   : > { %2329 = vmatmul.msk.f32.gmra.mxu1 %vm634_vm11, %v5364_v12  ;;  %2337 = vmatmul.msk.f32.gmra.mxu3 %vm642_vm10, %v5364_v12  ;;  %v775_v12 = vand.u32 4294901760, %v774_v47  ;;  %v2315_v51 = vsel %vm636_vm15, 1.0, %v5478_v31  ;;  %v840_v31 = vsub.f32 %v3792_v3, %v5480_v57 }
 0x114   : > { %762 = vmatmul.f32.gmra.mxu0 %v761_v46  ;;  %826 = vmatmul.f32.gmra.mxu2 %v825_v21  ;;  %v769_v46 = vand.u32 4294901760, %v768_v26  ;;  %v833_v21 = vand.u32 4294901760, %v832_v8  ;;  %v3819_v8 = vsub.f32 %v2323_v63, %v2323_v63  ;;  %v782_v26 = vsub.f32 %v2315_v51, %v2315_v51 }
 0x115   : > { %v776_v2 = vsub.f32 %v774_v47, %v775_v12  ;;  %v841_v55 = vand.u32 4294901760, %v840_v31  ;;  %v5481_v63 = vand.u32 4294901760, %v3597_v1 }
 0x116   : > { %v783_v53 = vand.u32 4294901760, %v782_v26  ;;  %v847_v17 = vand.u32 4294901760, %v3819_v8 }
 0x117   : > { %v777_v22 = vand.u32 4294901760, %v776_v2 }
 0x118   : > { %v848_v2 = vsub.f32 %v3819_v8, %v847_v17 }
 0x11b   : > { %2330 = vmatmul.msk.f32.gmra.mxu1 %vm635_vm13, %v5479_v28  ;;  %2338 = vmatmul.msk.f32.gmra.mxu3 %vm643_vm12, %v5479_v28 }
 0x11c   : > { %770 = vmatmul.f32.gmra.mxu0 %v769_v46  ;;  %834 = vmatmul.f32.gmra.mxu2 %v833_v21  ;;  %v784_v46 = vsub.f32 %v782_v26, %v783_v53  ;;  %v849_v21 = vand.u32 4294901760, %v848_v2 }
 0x11e   : > { %v785_v57 = vand.u32 4294901760, %v784_v46  ;;  %v5490_v46 = vand.u32 4294901760, %v3723_v32 }
 0x123   : > { %2331 = vmatmul.msk.f32.gmra.mxu1 %vm636_vm15, %v5479_v28  ;;  %2339 = vmatmul.msk.f32.gmra.mxu3 %vm644_vm14, %v5479_v28 }
 0x124   : > { %778 = vmatmul.f32.gmra.mxu0 %v777_v22  ;;  %842 = vmatmul.f32.gmra.mxu2 %v841_v55  ;;  %v5482_v22 = vand.u32 4294901760, %v3593_v38  ;;  %v5483_v55 = vand.u32 4294901760, %v3679_v56 }
 0x12b   : > { %1179 = vmatmul.f32.vlgmr.msrb.gmra.mxu3 %v5481_v63  ;;  %2356 = vmatmul.msk.f32.vlgmr.msrb.gmra.mxu1 %vm629_vm2, %v5479_v28  ;;  %v5491_v63 = vand.u32 4294901760, %v3756_v20 }
 0x12c   : > { %786 = vmatmul.f32.gmra.mxu0 %v785_v57  ;;  %850 = vmatmul.f32.gmra.mxu2 %v849_v21 }
 0x133   : > { %1185 = vmatmul.f32.gmra.mxu3 %v5482_v22  ;;  %2357 = vmatmul.msk.f32.gmra.mxu1 %vm630_vm0, %v5479_v28 }
 0x134   : > { %1065 = vmatmul.f32.vlgmr.msrb.gmra.mxu2 %v3597_v1  ;;  %2340 = vmatmul.msk.f32.vlgmr.msrb.gmra.mxu0 %vm629_vm2, %v5479_v28  ;;  %v5484_v1 = vand.u32 4294901760, %v3683_v45 }
 0x13b   : > { %1191 = vmatmul.f32.gmra.mxu3 %v5483_v55  ;;  %2358 = vmatmul.msk.f32.gmra.mxu1 %vm631_vm7, %v5479_v28 }
 0x13c   : > { %1070 = vmatmul.f32.gmra.mxu2 %v3593_v38  ;;  %2341 = vmatmul.msk.f32.gmra.mxu0 %vm630_vm0, %v5479_v28 }
 0x143   : > { %1197 = vmatmul.f32.gmra.mxu3 %v5484_v1  ;;  %2359 = vmatmul.msk.f32.gmra.mxu1 %vm632_vm6, %v5479_v28 }
 0x144   : > { %1075 = vmatmul.f32.gmra.mxu2 %v3679_v56  ;;  %2342 = vmatmul.msk.f32.gmra.mxu0 %vm631_vm7, %v5479_v28 }
 0x14b   : > { %1203 = vmatmul.f32.gmra.mxu3 %v5485_v7  ;;  %2360 = vmatmul.msk.f32.gmra.mxu1 %vm633_vm9, %v5479_v28  ;;  %v5492_v7 = vand.u32 4294901760, %v3792_v3 }
 0x14c   : > { %1080 = vmatmul.f32.gmra.mxu2 %v3683_v45  ;;  %2343 = vmatmul.msk.f32.gmra.mxu0 %vm632_vm6, %v5479_v28 }
 0x153   : > { %1209 = vmatmul.f32.gmra.mxu3 %v767_v44  ;;  %2361 = vmatmul.msk.f32.gmra.mxu1 %vm634_vm11, %v5479_v28 }
 0x154   : > { %1085 = vmatmul.f32.gmra.mxu2 %v3725_v33  ;;  %2344 = vmatmul.msk.f32.gmra.mxu0 %vm633_vm9, %v5479_v28 }
 0x15b   : > { %1215 = vmatmul.f32.gmra.mxu3 %v775_v12  ;;  %2362 = vmatmul.msk.f32.gmra.mxu1 %vm635_vm13, %v5479_v28 }
 0x15c   : > { %1090 = vmatmul.f32.gmra.mxu2 %v3758_v41  ;;  %2345 = vmatmul.msk.f32.gmra.mxu0 %vm634_vm11, %v5479_v28  ;;  %v5488_v41 = vand.u32 4294901760, %v3640_v14 }
 0x163   : > { %1221 = vmatmul.f32.gmra.mxu3 %v783_v53  ;;  %2363 = vmatmul.msk.f32.gmra.mxu1 %vm636_vm15, %v5479_v28 }
 0x164   : > { %1095 = vmatmul.f32.gmra.mxu2 %v774_v47  ;;  %2346 = vmatmul.msk.f32.gmra.mxu0 %vm635_vm13, %v5479_v28 }
 0x168   : > { %v3912_v33 = vpop.f32.mrf.mxu1 }
 0x16b   : > { %1227 = vmatmul.f32.gmra.mxu3 %v5486_v27  ;;  %2364 = vmatmul.msk.f32.gmra.mxu1 %vm637_vm1, %v5479_v28 }
 0x16c   : > { %1100 = vmatmul.f32.gmra.mxu2 %v782_v26  ;;  %2347 = vmatmul.msk.f32.gmra.mxu0 %vm636_vm15, %v5479_v28 }
 0x16e   : > { %v984_v53 = vpop.f32.mrf.mxu3 }
 0x170   : > { %v3924_v12 = vpop.f32.mrf.mxu1 }
 0x171   : > { %v3926_v38 = vpop.f32.mrf.mxu0 }
 0x173   : > { %1233 = vmatmul.f32.gmra.mxu3 %v5487_v34  ;;  %2365 = vmatmul.msk.f32.gmra.mxu1 %vm638_vm3, %v5479_v28 }
 0x174   : > { %1105 = vmatmul.f32.gmra.mxu2 %v3595_v19  ;;  %2348 = vmatmul.msk.f32.gmra.mxu0 %vm637_vm1, %v5479_v28 }
 0x176   : > { %v988_v18 = vpop.f32.mrf.mxu3 }
 0x177   : > { %v795_v25 = vpop.f32.mrf.mxu2 }
 0x178   : > { %v3939_v56 = vadd.f32 %v984_v53, %v795_v25  ;;  %v3941_v45 = vpop.f32.mrf.mxu1 }
 0x179   : > { %v3943_v50 = vpop.f32.mrf.mxu0 }
 0x17b   : > { %1239 = vmatmul.f32.gmra.mxu3 %v5488_v41  ;;  %2366 = vmatmul.msk.f32.gmra.mxu1 %vm639_vm4, %v5479_v28 }
 0x17c   : > { %1110 = vmatmul.f32.gmra.mxu2 %v3635_v52  ;;  %2349 = vmatmul.msk.f32.gmra.mxu0 %vm638_vm3, %v5479_v28 }
 0x17e   : > { %v992_v16 = vpop.f32.mrf.mxu3 }
 0x17f   : > { %v803_v19 = vpop.f32.mrf.mxu2 }
 0x180   : > { %v3956_v61 = vadd.f32 %v988_v18, %v803_v19  ;;  %v3958_v44 = vpop.f32.mrf.mxu1 }
 0x181   : > { %v3960_v47 = vpop.f32.mrf.mxu0 }
 0x183   : > { %1245 = vmatmul.f32.gmra.mxu3 %v5489_v9  ;;  %2367 = vmatmul.msk.f32.gmra.mxu1 %vm640_vm5, %v5479_v28  ;;  %v953_v9 = vadd.f32 %v3912_v33, %v3926_v38 }
 0x184   : > { %1115 = vmatmul.f32.gmra.mxu2 %v3640_v14  ;;  %2350 = vmatmul.msk.f32.gmra.mxu0 %vm639_vm4, %v5479_v28 }
 0x186   : > { %v996_v15 = vpop.f32.mrf.mxu3 }
 0x187   : > { %v811_v52 = vpop.f32.mrf.mxu2 }
 0x188   : > { %v3973_v51 = vadd.f32 %v992_v16, %v811_v52  ;;  %v3975_v26 = vpop.f32.mrf.mxu1 }
 0x189   : > { %v3977_v31 = vpop.f32.mrf.mxu0 }
 0x18b   : > { %1251 = vmatmul.f32.gmra.mxu3 %v5490_v46  ;;  %2368 = vmatmul.msk.f32.gmra.mxu1 %vm641_vm8, %v5479_v28 }
 0x18c   : > { %1120 = vmatmul.f32.gmra.mxu2 %v3681_v37  ;;  %2351 = vmatmul.msk.f32.gmra.mxu0 %vm640_vm5, %v5479_v28 }
 0x18e   : > { %v1000_v62 = vpop.f32.mrf.mxu3 }
 0x18f   : > { %v819_v14 = vpop.f32.mrf.mxu2 }
 0x190   : > { %v3990_v2 = vadd.f32 %v996_v15, %v819_v14  ;;  %v3992_v57 = vpop.f32.mrf.mxu1 }
 0x191   : > { %v3994_v21 = vpop.f32.mrf.mxu0 }
 0x193   : > { %1257 = vmatmul.f32.gmra.mxu3 %v5491_v63  ;;  %2369 = vmatmul.msk.f32.gmra.mxu1 %vm642_vm10, %v5479_v28 }
 0x194   : > { %1125 = vmatmul.f32.gmra.mxu2 %v3723_v32  ;;  %2352 = vmatmul.msk.f32.gmra.mxu0 %vm641_vm8, %v5479_v28 }
 0x196   : > { %v1004_v39 = vpop.f32.mrf.mxu3 }
 0x197   : > { %v827_v37 = vpop.f32.mrf.mxu2 }
 0x198   : > { %v4007_v22 = vadd.f32 %v1000_v62, %v827_v37  ;;  %v4009_v55 = vpop.f32.mrf.mxu1 }
 0x199   : > { %v4011_v1 = vpop.f32.mrf.mxu0 }
 0x19b   : > { %1263 = vmatmul.f32.gmra.mxu3 %v5492_v7  ;;  %2370 = vmatmul.msk.f32.gmra.mxu1 %vm643_vm12, %v5479_v28 }
 0x19c   : > { %1130 = vmatmul.f32.gmra.mxu2 %v3756_v20  ;;  %2353 = vmatmul.msk.f32.gmra.mxu0 %vm642_vm10, %v5479_v28 }
 0x19e   : > { %v1008_v29 = vpop.f32.mrf.mxu3 }
 0x19f   : > { %v835_v32 = vpop.f32.mrf.mxu2 }
 0x1a0   : > { %v4024_v27 = vadd.f32 %v1004_v39, %v835_v32  ;;  %v4026_v53 = vpop.f32.mrf.mxu1  ;;  %v677_v39 = vld [vmem:[#allocation8] sm:$0xff] }
 0x1a1   : > { %v4028_v34 = vpop.f32.mrf.mxu0 }
 0x1a3   : > { %1269 = vmatmul.f32.gmra.mxu3 %v847_v17  ;;  %2371 = vmatmul.msk.f32.gmra.mxu1 %vm644_vm14, %v5479_v28 }
 0x1a4   : > { %1135 = vmatmul.f32.gmra.mxu2 %v3792_v3  ;;  %2354 = vmatmul.msk.f32.gmra.mxu0 %vm643_vm12, %v5479_v28 }
 0x1a6   : > { %v1012_v58 = vpop.f32.mrf.mxu3 }
 0x1a7   : > { %v843_v20 = vpop.f32.mrf.mxu2 }
 0x1a8   : > { %v4041_v18 = vadd.f32 %v1008_v29, %v843_v20  ;;  %v1436_v25 = vpop.f32.mrf.mxu1  ;;  %v678_v20 = vld [vmem:[#allocation8 + $0x8] sm:$0xff] }
 0x1a9   : > { %v4043_v41 = vpop.f32.mrf.mxu0 }
 0x1ac   : > { %1140 = vmatmul.f32.gmra.mxu2 %v3819_v8  ;;  %2355 = vmatmul.msk.f32.gmra.mxu0 %vm644_vm14, %v5479_v28  ;;  %v957_v28 = vadd.f32 %v3924_v12, %v3943_v50 }
 0x1ae   : > { %v1180_v17 = vpop.f32.mrf.mxu3 }
 0x1af   : > { %v851_v3 = vpop.f32.mrf.mxu2 }
 0x1b0   : > { %v4050_v16 = vadd.f32 %v1012_v58, %v851_v3  ;;  %v1440_v40 = vpop.f32.mrf.mxu1  ;;  %v961_v3 = vadd.f32 %v3941_v45, %v3960_v47 }
 0x1b1   : > { %v1339_v19 = vpop.f32.mrf.mxu0 }
 0x1b6   : > { %v1186_v15 = vpop.f32.mrf.mxu3 }
 0x1b7   : > { %v1066_v52 = vpop.f32.mrf.mxu2 }
 0x1b8   : > { %v1067_v46 = vadd.f32 %v1066_v52, %v953_v9  ;;  %v1444_v62 = vpop.f32.mrf.mxu1 }
 0x1b9   : > { %v1343_v14 = vpop.f32.mrf.mxu0 }
 0x1ba   : > { %v1181_v8 = vadd.f32 %v1180_v17, %v1067_v46 }
 0x1bc   : > { %v1340_v63 = vadd.f32 %v1339_v19, %v1181_v8 }
 0x1be   : > { %v1437_v10 = vadd.f32 %v1436_v25, %v1340_v63  ;;  %v1192_v5 = vpop.f32.mrf.mxu3  ;;  %v679_v63 = vld [vmem:[#allocation8 + $0x10] sm:$0xff] }
 0x1bf   : > { %v1071_v37 = vpop.f32.mrf.mxu2 }
 0x1c0   : > { %v1499_v7 = vadd.f32 %v1437_v10, %v677_v39  ;;  %v1072_v29 = vadd.f32 %v1071_v37, %v957_v28  ;;  %v1448_v32 = vpop.f32.mrf.mxu1  ;;  %v965_v39 = vadd.f32 %v3958_v44, %v3977_v31 }
 0x1c1   : > { %v1347_v58 = vpop.f32.mrf.mxu0 }
 0x1c2   : > { %1515 = vst [vmem:[#allocation8] sm:$0xff] %v1499_v7  ;;  %v1187_v33 = vadd.f32 %v1186_v15, %v1072_v29  ;;  %v680_v29 = vld [vmem:[#allocation8 + $0x18] sm:$0xff] }
 0x1c4   : > { %v1344_v38 = vadd.f32 %v1343_v14, %v1187_v33  ;;  %v969_v33 = vadd.f32 %v3975_v26, %v3994_v21 }
 0x1c6   : > { %v1441_v17 = vadd.f32 %v1440_v40, %v1344_v38  ;;  %v1198_v19 = vpop.f32.mrf.mxu3 }
 0x1c7   : > { %v1076_v9 = vpop.f32.mrf.mxu2 }
 0x1c8   : > { %v1500_v52 = vadd.f32 %v1441_v17, %v678_v20  ;;  %v1077_v46 = vadd.f32 %v1076_v9, %v961_v3  ;;  %v1452_v12 = vpop.f32.mrf.mxu1  ;;  %v681_v9 = vld [vmem:[#allocation8 + $0x20] sm:$0xff] }
 0x1c9   : > { %v1351_v50 = vpop.f32.mrf.mxu0 }
 0x1ca   : > { %1516 = vst [vmem:[#allocation8 + $0x8] sm:$0xff] %v1500_v52  ;;  %v1193_v25 = vadd.f32 %v1192_v5, %v1077_v46  ;;  %v973_v52 = vadd.f32 %v3992_v57, %v4011_v1 }
 0x1cc   : > { %v1348_v8 = vadd.f32 %v1347_v58, %v1193_v25 }
 0x1ce   : > { %v1445_v15 = vadd.f32 %v1444_v62, %v1348_v8  ;;  %v1204_v14 = vpop.f32.mrf.mxu3 }
 0x1cf   : > { %v1081_v28 = vpop.f32.mrf.mxu2 }
 0x1d0   : > { %v1501_v10 = vadd.f32 %v1445_v15, %v679_v63  ;;  %v1082_v37 = vadd.f32 %v1081_v28, %v965_v39  ;;  %v1456_v45 = vpop.f32.mrf.mxu1  ;;  %v682_v63 = vld [vmem:[#allocation8 + $0x28] sm:$0xff]  ;;  %v977_v15 = vadd.f32 %v4009_v55, %v4028_v34 }
 0x1d1   : > { %v1355_v47 = vpop.f32.mrf.mxu0 }
 0x1d2   : > { %1517 = vst [vmem:[#allocation8 + $0x10] sm:$0xff] %v1501_v10  ;;  %v1199_v40 = vadd.f32 %v1198_v19, %v1082_v37 }
 0x1d4   : > { %v1352_v7 = vadd.f32 %v1351_v50, %v1199_v40  ;;  %v683_v40 = vld [vmem:[#allocation8 + $0x30] sm:$0xff] }
 0x1d6   : > { %v1449_v5 = vadd.f32 %v1448_v32, %v1352_v7  ;;  %v1210_v58 = vpop.f32.mrf.mxu3  ;;  %v981_v7 = vadd.f32 %v4026_v53, %v4043_v41 }
 0x1d7   : > { %v1086_v38 = vpop.f32.mrf.mxu2 }
 0x1d8   : > { %v1502_v20 = vadd.f32 %v1449_v5, %v680_v29  ;;  %v1087_v3 = vadd.f32 %v1086_v38, %v969_v33  ;;  %v1460_v62 = vpop.f32.mrf.mxu1 }
 0x1d9   : > { %v1359_v44 = vpop.f32.mrf.mxu0 }
 0x1da   : > { %1518 = vst [vmem:[#allocation8 + $0x18] sm:$0xff] %v1502_v20  ;;  %v1205_v31 = vadd.f32 %v1204_v14, %v1087_v3  ;;  %v684_v3 = vld [vmem:[#allocation8 + $0x38] sm:$0xff] }
 0x1dc   : > { %v1356_v17 = vadd.f32 %v1355_v47, %v1205_v31 }
 0x1de   : > { %v1453_v19 = vadd.f32 %v1452_v12, %v1356_v17  ;;  %v1216_v46 = vpop.f32.mrf.mxu3 }
 0x1df   : > { %v1091_v50 = vpop.f32.mrf.mxu2 }
 0x1e0   : > { %v1503_v25 = vadd.f32 %v1453_v19, %v681_v9  ;;  %v1092_v8 = vadd.f32 %v1091_v50, %v973_v52  ;;  %v1464_v39 = vpop.f32.mrf.mxu1 }
 0x1e1   : > { %v1363_v26 = vpop.f32.mrf.mxu0 }
 0x1e2   : > { %1519 = vst [vmem:[#allocation8 + $0x20] sm:$0xff] %v1503_v25  ;;  %v1211_v21 = vadd.f32 %v1210_v58, %v1092_v8 }
 0x1e4   : > { %v1360_v32 = vadd.f32 %v1359_v44, %v1211_v21 }
 0x1e6   : > { %v1457_v14 = vadd.f32 %v1456_v45, %v1360_v32  ;;  %v1222_v28 = vpop.f32.mrf.mxu3 }
 0x1e7   : > { %v1096_v10 = vpop.f32.mrf.mxu2 }
 0x1e8   : > { %v1504_v37 = vadd.f32 %v1457_v14, %v682_v63  ;;  %v1097_v47 = vadd.f32 %v1096_v10, %v977_v15  ;;  %v1468_v5 = vpop.f32.mrf.mxu1  ;;  %v686_v14 = vld [vmem:[#allocation8 + $0x48] sm:$0xff] }
 0x1e9   : > { %v1367_v57 = vpop.f32.mrf.mxu0 }
 0x1ea   : > { %1520 = vst [vmem:[#allocation8 + $0x28] sm:$0xff] %v1504_v37  ;;  %v1217_v1 = vadd.f32 %v1216_v46, %v1097_v47 }
 0x1ec   : > { %v1364_v12 = vadd.f32 %v1363_v26, %v1217_v1 }
 0x1ee   : > { %v1461_v29 = vadd.f32 %v1460_v62, %v1364_v12  ;;  %v1228_v33 = vpop.f32.mrf.mxu3  ;;  %v685_v62 = vld [vmem:[#allocation8 + $0x40] sm:$0xff] }
 0x1ef   : > { %v1101_v58 = vpop.f32.mrf.mxu2 }
 0x1f0   : > { %v1505_v38 = vadd.f32 %v1461_v29, %v683_v40  ;;  %v1102_v20 = vadd.f32 %v1101_v58, %v981_v7  ;;  %v1472_v19 = vpop.f32.mrf.mxu1  ;;  %v687_v7 = vld [vmem:[#allocation8 + $0x50] sm:$0xff] }
 0x1f1   : > { %v1371_v55 = vpop.f32.mrf.mxu0 }
 0x1f2   : > { %1521 = vst [vmem:[#allocation8 + $0x30] sm:$0xff] %v1505_v38  ;;  %v1223_v34 = vadd.f32 %v1222_v28, %v1102_v20 }
 0x1f4   : > { %v1368_v45 = vadd.f32 %v1367_v57, %v1223_v34 }
 0x1f6   : > { %v1465_v44 = vadd.f32 %v1464_v39, %v1368_v45  ;;  %v1234_v31 = vpop.f32.mrf.mxu3 }
 0x1f7   : > { %v1106_v17 = vpop.f32.mrf.mxu2 }
 0x1f8   : > { %v1506_v9 = vadd.f32 %v1465_v44, %v684_v3  ;;  %v1107_v52 = vadd.f32 %v1106_v17, %v3939_v56  ;;  %v1476_v39 = vpop.f32.mrf.mxu1 }
 0x1f9   : > { %v1375_v46 = vpop.f32.mrf.mxu0 }
 0x1fa   : > { %1522 = vst [vmem:[#allocation8 + $0x38] sm:$0xff] %v1506_v9  ;;  %v1229_v53 = vadd.f32 %v1228_v33, %v1107_v52 }
 0x1fc   : > { %v1372_v41 = vadd.f32 %v1371_v55, %v1229_v53  ;;  %v688_v55 = vld [vmem:[#allocation8 + $0x58] sm:$0xff] }
 0x1fe   : > { %v1469_v50 = vadd.f32 %v1468_v5, %v1372_v41  ;;  %v1240_v25 = vpop.f32.mrf.mxu3 }
 0x1ff   : > { %v1111_v8 = vpop.f32.mrf.mxu2 }
 0x200   : > { %v1507_v26 = vadd.f32 %v1469_v50, %v685_v62  ;;  %v1112_v21 = vadd.f32 %v1111_v8, %v3956_v61  ;;  %v1480_v40 = vpop.f32.mrf.mxu1 }
 0x201   : > { %v1379_v32 = vpop.f32.mrf.mxu0 }
 0x202   : > { %1523 = vst [vmem:[#allocation8 + $0x40] sm:$0xff] %v1507_v26  ;;  %v1235_v63 = vadd.f32 %v1234_v31, %v1112_v21  ;;  %v690_v26 = vld [vmem:[#allocation8 + $0x68] sm:$0xff] }
 0x204   : > { %v1376_v15 = vadd.f32 %v1375_v46, %v1235_v63 }
 0x206   : > { %v1473_v28 = vadd.f32 %v1472_v19, %v1376_v15  ;;  %v1246_v47 = vpop.f32.mrf.mxu3  ;;  %v689_v19 = vld [vmem:[#allocation8 + $0x60] sm:$0xff] }
 0x207   : > { %v1116_v56 = vpop.f32.mrf.mxu2 }
 0x208   : > { %v1508_v10 = vadd.f32 %v1473_v28, %v686_v14  ;;  %v1117_v37 = vadd.f32 %v1116_v56, %v3973_v51  ;;  %v1484_v51 = vpop.f32.mrf.mxu1 }
 0x209   : > { %v1383_v1 = vpop.f32.mrf.mxu0 }
 0x20a   : > { %1524 = vst [vmem:[#allocation8 + $0x48] sm:$0xff] %v1508_v10  ;;  %v1241_v57 = vadd.f32 %v1240_v25, %v1117_v37  ;;  %v691_v10 = vld [vmem:[#allocation8 + $0x70] sm:$0xff] }
 0x20c   : > { %v1380_v12 = vadd.f32 %v1379_v32, %v1241_v57 }
 0x20e   : > { %v1477_v29 = vadd.f32 %v1476_v39, %v1380_v12  ;;  %v1252_v38 = vpop.f32.mrf.mxu3 }
 0x20f   : > { %v1121_v61 = vpop.f32.mrf.mxu2 }
 0x210   : > { %v1509_v33 = vadd.f32 %v1477_v29, %v687_v7  ;;  %v1122_v5 = vadd.f32 %v1121_v61, %v3990_v2  ;;  %v1488_v50 = vpop.f32.mrf.mxu1  ;;  %v692_v61 = vld [vmem:[#allocation8 + $0x78] sm:$0xff] }
 0x211   : > { %v1387_v34 = vpop.f32.mrf.mxu0 }
 0x212   : > { %1525 = vst [vmem:[#allocation8 + $0x50] sm:$0xff] %v1509_v33  ;;  %v1247_v58 = vadd.f32 %v1246_v47, %v1122_v5 }
 0x214   : > { %v1384_v20 = vadd.f32 %v1383_v1, %v1247_v58 }
 0x216   : > { %v1481_v45 = vadd.f32 %v1480_v40, %v1384_v20  ;;  %v1258_v52 = vpop.f32.mrf.mxu3 }
 0x217   : > { %v1126_v3 = vpop.f32.mrf.mxu2 }
 0x218   : > { %v1510_v44 = vadd.f32 %v1481_v45, %v688_v55  ;;  %v1127_v31 = vadd.f32 %v1126_v3, %v4007_v22  ;;  %v1492_v28 = vpop.f32.mrf.mxu1 }
 0x219   : > { %v1391_v53 = vpop.f32.mrf.mxu0 }
 0x21a   : > { %1526 = vst [vmem:[#allocation8 + $0x58] sm:$0xff] %v1510_v44  ;;  %v1253_v17 = vadd.f32 %v1252_v38, %v1127_v31 }
 0x21c   : > { %v1388_v9 = vadd.f32 %v1387_v34, %v1253_v17 }
 0x21e   : > { %v1485_v46 = vadd.f32 %v1484_v51, %v1388_v9  ;;  %v1264_v32 = vpop.f32.mrf.mxu3 }
 0x21f   : > { %v1131_v2 = vpop.f32.mrf.mxu2 }
 0x220   : > { %v1511_v41 = vadd.f32 %v1485_v46, %v689_v19  ;;  %v1132_v62 = vadd.f32 %v1131_v2, %v4024_v27  ;;  %v1496_v29 = vpop.f32.mrf.mxu1 }
 0x221   : > { %v1395_v15 = vpop.f32.mrf.mxu0 }
 0x222   : > { %1527 = vst [vmem:[#allocation8 + $0x60] sm:$0xff] %v1511_v41  ;;  %v1259_v25 = vadd.f32 %v1258_v52, %v1132_v62 }
 0x224   : > { %v1392_v8 = vadd.f32 %v1391_v53, %v1259_v25 }
 0x226   : > { %v1489_v21 = vadd.f32 %v1488_v50, %v1392_v8  ;;  %v1270_v1 = vpop.f32.mrf.mxu3 }
 0x227   : > { %v1136_v63 = vpop.f32.mrf.mxu2 }
 0x228   : > { %v1512_v22 = vadd.f32 %v1489_v21, %v690_v26  ;;  %v1137_v39 = vadd.f32 %v1136_v63, %v4041_v18 }
 0x229   : > { %v1399_v40 = vpop.f32.mrf.mxu0 }
 0x22a   : > { %1528 = vst [vmem:[#allocation8 + $0x68] sm:$0xff] %v1512_v22  ;;  %v1265_v14 = vadd.f32 %v1264_v32, %v1137_v39 }
 0x22c   : > { %v1396_v56 = vadd.f32 %v1395_v15, %v1265_v14 }
 0x22e   : > { %v1493_v37 = vadd.f32 %v1492_v28, %v1396_v56 }
 0x22f   : > { %v1141_v47 = vpop.f32.mrf.mxu2 }
 0x230   : > { %v1513_v27 = vadd.f32 %v1493_v37, %v691_v10  ;;  %v1142_v57 = vadd.f32 %v1141_v47, %v4050_v16 }
 0x232   : > { %1529 = vst [vmem:[#allocation8 + $0x70] sm:$0xff] %v1513_v27  ;;  %v1271_v12 = vadd.f32 %v1270_v1, %v1142_v57 }
 0x234   : > { %v1400_v7 = vadd.f32 %v1399_v40, %v1271_v12 }
 0x236   : > { %v1497_v33 = vadd.f32 %v1496_v29, %v1400_v7  ;;  %1537 = sbr.rel (%p2306_p13) target bundleno = 574 (0x23e), region = 60 }
 0x238   : > { %v1514_v18 = vadd.f32 %v1497_v33, %v692_v61 }
 0x23a   : > { %1530 = vst [vmem:[#allocation8 + $0x78] sm:$0xff] %v1514_v18 }
 0x23b   : > { %v2889_v5 = vmov 0.0  }
 0x23c   : > { %1538 = vst [vmem:[#allocation9] sm:$0x1] %v2889_v5 }
 0x23d   : > { %1539 = vst [vmem:[#allocation11] sm:$0x1] %v2889_v5 }
 0x23e PF: > { %v5493_v58 = vlaneseq  ;;  %v4081_v16 = vmul.f32 %v3085_v24, %v3085_v24  ;;  %v2890_v20 = vmov 2.0   ;;  %v4085_v55 = vmul.f32 %v3095_v30, %v3095_v30  ;;  %p2445_p0 = scmp.eq.s32.totalorder %s2960_s27, 1  ;;  %s2119_s18 = sshll.u32 %s5295_s4, 4  ;;  %s2120_s18 = int_to_ptr.hbm [resolvable:$true] %s2119_s18 }
 0x23f   : > { %2579 = vrcp.f32 %v2890_v20  ;;  %v4089_v34 = vmul.f32 %v3105_v36, %v3105_v36  ;;  %v4093_v45 = vmul.f32 %v3115_v42, %v3115_v42  ;;  %v4097_v51 = vmul.f32 %v3125_v48, %v3125_v48  ;;  %v5509_v20 = vld [vmem:[#allocation50_spill] sm:$0xff]  ;;  %s2891_s19 = smov [#allocation8]   ;;  %s2892_s9 = smov 128  }
 0x240   : > { %v1541_v38 = vshrl.u32 %v5493_v58, 7  ;;  %v4101_v17 = vmul.f32 %v3135_v54, %v3135_v54  ;;  %2581 = vlog2.f32 %v3055_v0  ;;  %v4157_v29 = vmul.f32 %v3145_v60, %v3145_v60  ;;  %s2117_s14 = sshll.u32 %s2891_s19, 4  ;;  %s2893_s2 = smov 8   ;;  %s2118_s14 = int_to_ptr.vmem [resolvable:$true] %s2117_s14 }
 0x241   : > { %2583 = vlog2.f32 %v3061_v6  ;;  %v4162_v61 = vmul.f32 %v3155_v4, %v3155_v4  ;;  %v4166_v33 = vmul.f32 %v3165_v13, %v3165_v13  ;;  %v4170_v18 = vmul.f32 %v3175_v23, %v3175_v23  ;;  %2423 = dma.vmem_to_hbm [thread:$0]  (%p2445_p0), %s2118_s14, 2048, %s2120_s18, [#allocation4], %s2892_s9, %s2892_s9, %s2893_s2  }
 0x242   : > { %v1542_v3 = vadd.s32 8, %v1541_v38  ;;  %v1543_v44 = vadd.s32 16, %v1541_v38  ;;  %v1544_v31 = vadd.s32 24, %v1541_v38  ;;  %v1545_v9 = vadd.s32 32, %v1541_v38  ;;  %s2894_s28 = smov [#allocation9]   ;;  %s2134_s7 = sshll.u32 %s5296_s5, 4  ;;  %s2135_s7 = int_to_ptr.hbm [resolvable:$true] %s2134_s7 }
 0x243   : > { %v1546_v52 = vadd.s32 40, %v1541_v38  ;;  %v1547_v19 = vadd.s32 48, %v1541_v38  ;;  %v1548_v46 = vadd.s32 56, %v1541_v38  ;;  %v1549_v53 = vadd.s32 64, %v1541_v38  ;;  %s2132_s23 = sshll.u32 %s2894_s28, 4  ;;  %s2895_s8 = smov [#allocation11]   ;;  %s2133_s23 = int_to_ptr.vmem [resolvable:$true] %s2132_s23 }
 0x244   : > { %v1550_v2 = vadd.s32 72, %v1541_v38  ;;  %v1551_v41 = vadd.s32 80, %v1541_v38  ;;  %v1552_v62 = vadd.s32 88, %v1541_v38  ;;  %v1553_v50 = vadd.s32 96, %v1541_v38  ;;  %s2144_s10 = sshll.u32 %s2895_s8, 4  ;;  %s2146_s20 = sshll.u32 %s5297_s6, 4  ;;  %s2145_s10 = int_to_ptr.vmem [resolvable:$true] %s2144_s10  ;;  %s2147_s20 = int_to_ptr.hbm [resolvable:$true] %s2146_s20 }
 0x245   : > { %v1554_v25 = vadd.s32 104, %v1541_v38  ;;  %v1555_v8 = vadd.s32 112, %v1541_v38  ;;  %v1556_v26 = vadd.s32 120, %v1541_v38  ;;  %v4103_v21 = vpop.eup %2579  ;;  %v4106_v32 = vadd.s32 %v1541_v38, %v3537_v59  ;;  %v5508_v38 = vld [vmem:[#allocation24_spill] sm:$0xff] }
 0x246   : > { %v4109_v63 = vadd.s32 %v1542_v3, %v3537_v59  ;;  %v4112_v22 = vadd.s32 %v1543_v44, %v3537_v59  ;;  %v4115_v39 = vadd.s32 %v1544_v31, %v3537_v59  ;;  %v4118_v15 = vadd.s32 %v1545_v9, %v3537_v59  ;;  %v5510_v44 = vld [vmem:[#allocation51_spill] sm:$0xff] }
 0x247   : > { %v4121_v14 = vadd.s32 %v1546_v52, %v3537_v59  ;;  %v4124_v28 = vadd.s32 %v1547_v19, %v3537_v59  ;;  %v4127_v56 = vadd.s32 %v1548_v46, %v3537_v59  ;;  %v4130_v10 = vadd.s32 %v1549_v53, %v3537_v59  ;;  %v5511_v52 = vld [vmem:[#allocation26_spill] sm:$0xff]  ;;  %v5512_v19 = vld [vmem:[#allocation52_spill] sm:$0xff] }
 0x248   : > { %5494 = vst [vmem:[#allocation54_spill] sm:$0xff] %v4112_v22  ;;  %v4133_v37 = vadd.s32 %v1550_v2, %v3537_v59  ;;  %v4136_v47 = vadd.s32 %v1551_v41, %v3537_v59  ;;  %v4139_v27 = vadd.s32 %v1552_v62, %v3537_v59  ;;  %v4142_v57 = vadd.s32 %v1553_v50, %v3537_v59  ;;  %v5513_v53 = vld [vmem:[#allocation28_spill] sm:$0xff]  ;;  %v5514_v2 = vld [vmem:[#allocation21_spill] sm:$0xff]  ;;  %v5515_v62 = vld [vmem:[#allocation22_spill] sm:$0xff] }
 0x249   : > { %5495 = vst [vmem:[#allocation55_spill] sm:$0xff] %v4115_v39  ;;  %v4145_v1 = vadd.s32 %v1554_v25, %v3537_v59  ;;  %v1623_v12 = vmul.f32 2.0, %v4103_v21  ;;  %v4150_v40 = vadd.s32 %v1555_v8, %v3537_v59  ;;  %v4153_v7 = vadd.s32 %v1556_v26, %v3537_v59  ;;  %v2582_v25 = vpop.eup %2581  ;;  %v5516_v8 = vld [vmem:[#allocation30_spill] sm:$0xff]  ;;  %v5517_v26 = vld [vmem:[#allocation23_spill] sm:$0xff] }
 0x24a   : > { %5496 = vst [vmem:[#allocation56_spill] sm:$0xff] %v4118_v15  ;;  %2585 = vlog2.f32 %v3067_v11  ;;  %v4175_v59 = vmul.f32 %v3185_v35, %v3185_v35  ;;  %v4179_v5 = vmul.f32 %v3194_v43, %v3194_v43  ;;  %v4183_v58 = vmul.f32 %v3201_v49, %v3201_v49 }
 0x24b   : > { %5497 = vst [vmem:[#allocation57_spill] sm:$0xff] %v4121_v14  ;;  %2587 = vlog2.f32 %v5508_v38  ;;  %v4188_v3 = vmul.f32 %v5509_v20, %v5509_v20  ;;  %v4192_v31 = vmul.f32 %v5510_v44, %v5510_v44  ;;  %v1624_v9 = vsub.f32 1.0, %v1623_v12 }
 0x24c   : > { %5498 = vst [vmem:[#allocation58_spill] sm:$0xff] %v4124_v28  ;;  %2589 = vlog2.f32 %v5511_v52  ;;  %v4197_v46 = vmul.f32 %v5512_v19, %v5512_v19  ;;  %v1709_v41 = vsub.f32 %v3085_v24, %v5514_v2  ;;  %v1710_v50 = vsub.f32 %v3095_v30, %v5515_v62  ;;  %v5521_v24 = vld [vmem:[#allocation31_spill] sm:$0xff]  ;;  %v5522_v30 = vld [vmem:[#allocation33_spill] sm:$0xff] }
 0x24d   : > { %5499 = vst [vmem:[#allocation59_spill] sm:$0xff] %v4127_v56  ;;  %2591 = vlog2.f32 %v5513_v53  ;;  %v1711_v12 = vsub.f32 %v3105_v36, %v5517_v26  ;;  %v1715_v2 = vsub.f32 %v3145_v60, %v5521_v24  ;;  %v1716_v62 = vsub.f32 %v3155_v4, %v5522_v30  ;;  %v5526_v28 = vld [vmem:[#allocation41_spill] sm:$0xff]  ;;  %v5528_v4 = vld [vmem:[#allocation43_spill] sm:$0xff] }
 0x24e   : > { %5500 = vst [vmem:[#allocation60_spill] sm:$0xff] %v4130_v10  ;;  %2593 = vlog2.f32 %v5516_v8  ;;  %v5523_v10 = vld [vmem:[#allocation35_spill] sm:$0xff]  ;;  %v1625_v26 = vmul.f32 %v4103_v21, %v1624_v9  ;;  %v4231_v24 = vsub.f32 %v3201_v49, %v5528_v4  ;;  %v4241_v30 = vmul.f32 0.6931472, %v2582_v25 }
 0x24f   : > { %5501 = vst [vmem:[#allocation61_spill] sm:$0xff] %v4133_v37  ;;  %v1717_v56 = vsub.f32 %v3165_v13, %v5523_v10  ;;  %v5529_v13 = vld [vmem:[#allocation45_spill] sm:$0xff]  ;;  %v5530_v9 = vld [vmem:[#allocation47_spill] sm:$0xff]  ;;  %vm1627_vm0 = vweird.f32 %v4103_v21  ;;  %v4275_v15 = vmul.f32 %v1715_v2, %v1715_v2 }
 0x250   : > { %5502 = vst [vmem:[#allocation62_spill] sm:$0xff] %v4136_v47  ;;  %v5520_v47 = vld [vmem:[#allocation29_spill] sm:$0xff]  ;;  %v4235_v10 = vsub.f32 %v5509_v20, %v5529_v13  ;;  %v4252_v20 = vmul.f32 %v1710_v50, %v1710_v50  ;;  %v4254_v13 = vmul.f32 %v1711_v12, %v1711_v12  ;;  %v1626_v25 = vadd.f32 %v4103_v21, %v1625_v26 }
 0x251   : > { %5503 = vst [vmem:[#allocation63_spill] sm:$0xff] %v4139_v27  ;;  %v2584_v27 = vpop.eup %2583  ;;  %v1714_v37 = vsub.f32 %v3135_v54, %v5520_v47  ;;  %v4226_v54 = vsub.f32 %v3194_v43, %v5526_v28  ;;  %v5527_v47 = vld [vmem:[#allocation32_spill] sm:$0xff]  ;;  %v5532_v43 = vld [vmem:[#allocation34_spill] sm:$0xff]  ;;  %v5533_v28 = vld [vmem:[#allocation49_spill] sm:$0xff]  ;;  %v4288_v26 = vmul.f32 %v1717_v56, %v1717_v56 }
 0x252   : > { %5504 = vst [vmem:[#allocation64_spill] sm:$0xff] %v4142_v57  ;;  %v2586_v36 = vpop.eup %2585  ;;  %2595 = vlog2.f32 %v5527_v47  ;;  %v4250_v4 = vmul.f32 0.6931472, %v2584_v27  ;;  %v5538_v27 = vld [vmem:[#allocation36_spill] sm:$0xff] }
 0x253   : > { %5505 = vst [vmem:[#allocation65_spill] sm:$0xff] %v4145_v1  ;;  %v5519_v1 = vld [vmem:[#allocation27_spill] sm:$0xff]  ;;  %v2588_v60 = vpop.eup %2587  ;;  %2597 = vlog2.f32 %v5532_v43  ;;  %v4260_v14 = vmul.f32 0.6931472, %v2586_v36  ;;  %v4269_v50 = vmul.f32 %v1714_v37, %v1714_v37  ;;  %v1628_v37 = vsel %vm1627_vm0, %v4103_v21, %v1626_v25 }
 0x254   : > { %5506 = vst [vmem:[#allocation66_spill] sm:$0xff] %v4150_v40  ;;  %v1713_v57 = vsub.f32 %v3125_v48, %v5519_v1  ;;  %v5525_v48 = vld [vmem:[#allocation39_spill] sm:$0xff]  ;;  %2599 = vlog2.f32 %v5538_v27  ;;  %v4304_v56 = vmul.f32 %v1628_v37, %v4081_v16  ;;  %v4315_v21 = vmul.f32 %v1628_v37, %v4089_v34 }
 0x255   : > { %5507 = vst [vmem:[#allocation67_spill] sm:$0xff] %v4153_v7  ;;  %v5518_v7 = vld [vmem:[#allocation25_spill] sm:$0xff]  ;;  %v1719_v1 = vsub.f32 %v3185_v35, %v5525_v48  ;;  %v2590_v35 = vpop.eup %2589  ;;  %v4248_v48 = vmul.f32 %v1709_v41, %v1709_v41  ;;  %v4264_v41 = vmul.f32 0.6931472, %v2588_v60  ;;  %v4312_v60 = vmul.f32 %v1628_v37, %v4085_v55 }
 0x256   : > { %v1712_v40 = vsub.f32 %v3115_v42, %v5518_v7  ;;  %v5524_v42 = vld [vmem:[#allocation37_spill] sm:$0xff]  ;;  %5531 = vst [vmem:[#allocation24_spill] sm:$0xff] %v4241_v30  ;;  %v2592_v49 = vpop.eup %2591  ;;  %v5551_v30 = vld [vmem:[#allocation48_spill] sm:$0xff]  ;;  %v4321_v16 = vmul.f32 %v1628_v37, %v4097_v51  ;;  %v4330_v55 = vmul.f32 %v1628_v37, %v4157_v29  ;;  %v4333_v34 = vmul.f32 %v1628_v37, %v4162_v61 }
 0x257   : > { %v1718_v7 = vsub.f32 %v3175_v23, %v5524_v42  ;;  %v4239_v23 = vsub.f32 %v5510_v44, %v5530_v9  ;;  %v4246_v42 = vsub.f32 %v5512_v19, %v5533_v28  ;;  %5534 = vst [vmem:[#allocation50_spill] sm:$0xff] %v4250_v4  ;;  %v2594_v9 = vpop.eup %2593  ;;  %v4262_v19 = vmul.f32 %v1713_v57, %v1713_v57  ;;  %v5543_v57 = vld [vmem:[#allocation40_spill] sm:$0xff] }
 0x258   : > { %v4256_v44 = vmul.f32 %v1712_v40, %v1712_v40  ;;  %5535 = vst [vmem:[#allocation51_spill] sm:$0xff] %v4260_v14  ;;  %v4266_v28 = vmul.f32 0.6931472, %v2590_v35  ;;  %v4271_v12 = vmul.f32 0.6931472, %v2592_v49  ;;  %v5540_v40 = vld [vmem:[#allocation38_spill] sm:$0xff]  ;;  %v2596_v36 = vpop.eup %2595  ;;  %v4281_v35 = vmul.f32 %v1716_v62, %v1716_v62 }
 0x259   : > { %5536 = vst [vmem:[#allocation26_spill] sm:$0xff] %v4264_v41  ;;  %2601 = vlog2.f32 %v5540_v40  ;;  %v4277_v39 = vmul.f32 0.6931472, %v2594_v9  ;;  %v2598_v22 = vpop.eup %2597  ;;  %v5545_v49 = vld [vmem:[#allocation42_spill] sm:$0xff]  ;;  %v5546_v9 = vld [vmem:[#allocation44_spill] sm:$0xff]  ;;  %v4293_v62 = vmul.f32 %v1718_v7, %v1718_v7  ;;  %v4299_v25 = vmul.f32 %v1719_v1, %v1719_v1 }
 0x25a   : > { %5537 = vst [vmem:[#allocation52_spill] sm:$0xff] %v4266_v28  ;;  %2603 = vlog2.f32 %v5543_v57  ;;  %v4295_v4 = vmul.f32 0.6931472, %v2596_v36  ;;  %v4306_v2 = vmul.f32 0.6931472, %v2598_v22  ;;  %v4318_v1 = vmul.f32 %v1628_v37, %v4093_v45 }
 0x25b   : > { %5539 = vst [vmem:[#allocation28_spill] sm:$0xff] %v4271_v12  ;;  %2605 = vlog2.f32 %v5545_v49  ;;  %v4327_v7 = vmul.f32 %v1628_v37, %v4101_v17  ;;  %v4336_v45 = vmul.f32 %v1628_v37, %v4166_v33  ;;  %v4342_v12 = vmul.f32 %v1628_v37, %v4175_v59 }
 0x25c   : > { %5541 = vst [vmem:[#allocation21_spill] sm:$0xff] %v4275_v15  ;;  %2607 = vlog2.f32 %v5546_v9  ;;  %v4301_v15 = vpop.eup %2599  ;;  %v4345_v17 = vmul.f32 %v1628_v37, %v4179_v5  ;;  %v1741_v29 = vmul.f32 2.0, %v3055_v0  ;;  %v4349_v33 = vmul.f32 %v1628_v37, %v4183_v58 }
 0x25d   : > { %5542 = vst [vmem:[#allocation22_spill] sm:$0xff] %v4277_v39  ;;  %v4339_v39 = vmul.f32 %v1628_v37, %v4170_v18  ;;  %v4352_v28 = vmul.f32 %v1628_v37, %v4188_v3  ;;  %v1742_v41 = vmul.f32 2.0, %v3061_v6  ;;  %v4357_v14 = vmul.f32 %v1628_v37, %v4192_v31 }
 0x25e   : > { %5544 = vst [vmem:[#allocation30_spill] sm:$0xff] %v4281_v35  ;;  %v5548_v35 = vld [vmem:[#allocation46_spill] sm:$0xff]  ;;  %v4360_v5 = vmul.f32 %v1628_v37, %v4197_v46  ;;  %v4370_v31 = vmul.f32 %v4226_v54, %v4226_v54  ;;  %v1743_v46 = vmul.f32 2.0, %v3067_v11  ;;  %v1745_v54 = vmul.f32 2.0, %v5511_v52 }
 0x25f   : > { %5547 = vst [vmem:[#allocation23_spill] sm:$0xff] %v4293_v62  ;;  %2609 = vlog2.f32 %v5548_v35  ;;  %v2602_v36 = vpop.eup %2601  ;;  %v4376_v62 = vmul.f32 %v4231_v24, %v4231_v24  ;;  %v4399_v18 = vmul.f32 %v4239_v23, %v4239_v23 }
 0x260   : > { %5549 = vst [vmem:[#allocation25_spill] sm:$0xff] %v4299_v25  ;;  %2611 = vlog2.f32 %v5551_v30  ;;  %v2604_v22 = vpop.eup %2603  ;;  %v1744_v25 = vmul.f32 2.0, %v5508_v38  ;;  %v4419_v23 = vmul.f32 0.6931472, %v2602_v36  ;;  %v1752_v36 = vmul.f32 2.0, %v5543_v57 }
 0x261   : > { %5550 = vst [vmem:[#allocation27_spill] sm:$0xff] %v4306_v2  ;;  %v2606_v51 = vpop.eup %2605 }
 0x262   : > { %5552 = vst [vmem:[#allocation29_spill] sm:$0xff] %v4315_v21  ;;  %v2608_v61 = vpop.eup %2607  ;;  %v4380_v21 = vmul.f32 %v1741_v29, %v3055_v0  ;;  %v4407_v24 = vmul.f32 %v1744_v25, %v5508_v38  ;;  %v1746_v29 = vmul.f32 2.0, %v5513_v53  ;;  %v4413_v0 = vmul.f32 %v1745_v54, %v5511_v52 }
 0x263   : > { %5553 = vst [vmem:[#allocation31_spill] sm:$0xff] %v4321_v16  ;;  %v4386_v16 = vmul.f32 %v1742_v41, %v3061_v6  ;;  %v4402_v6 = vmul.f32 %v1743_v46, %v3067_v11  ;;  %v4417_v11 = vmul.f32 0.6931472, %v4301_v15  ;;  %v4421_v46 = vmul.f32 0.6931472, %v2604_v22 }
 0x264   : > { %5554 = vst [vmem:[#allocation33_spill] sm:$0xff] %v4327_v7  ;;  %2613 = vrcp.f32 %v4380_v21  ;;  %v4425_v38 = vmul.f32 %v4246_v42, %v4246_v42  ;;  %v4427_v25 = vmul.f32 0.6931472, %v2606_v51  ;;  %v1747_v52 = vmul.f32 2.0, %v5516_v8 }
 0x265   : > { %5555 = vst [vmem:[#allocation35_spill] sm:$0xff] %v4336_v45  ;;  %v2610_v59 = vpop.eup %2609  ;;  %2615 = vrcp.f32 %v4386_v16  ;;  %v1748_v42 = vmul.f32 2.0, %v5527_v47  ;;  %v4442_v51 = vmul.f32 %v1746_v29, %v5513_v53  ;;  %v1750_v7 = vmul.f32 2.0, %v5538_v27 }
 0x266   : > { %5556 = vst [vmem:[#allocation37_spill] sm:$0xff] %v4339_v39  ;;  %v2612_v58 = vpop.eup %2611  ;;  %2617 = vrcp.f32 %v4402_v6  ;;  %v4433_v54 = vmul.f32 0.6931472, %v2610_v59  ;;  %v1751_v41 = vmul.f32 2.0, %v5540_v40  ;;  %v1753_v53 = vmul.f32 2.0, %v5545_v49 }
 0x267   : > { %5557 = vst [vmem:[#allocation39_spill] sm:$0xff] %v4342_v12  ;;  %v4435_v15 = vmul.f32 0.6931472, %v2612_v58  ;;  %2619 = vrcp.f32 %v4407_v24  ;;  %v1749_v58 = vmul.f32 2.0, %v5532_v43  ;;  %v4457_v29 = vmul.f32 %v1747_v52, %v5516_v8 }
 0x268   : > { %5558 = vst [vmem:[#allocation41_spill] sm:$0xff] %v4345_v17  ;;  %2621 = vrcp.f32 %v4413_v0  ;;  %v4467_v22 = vmul.f32 %v1748_v42, %v5527_v47  ;;  %v4478_v59 = vmul.f32 %v1750_v7, %v5538_v27  ;;  %v4481_v3 = vmul.f32 %v1751_v41, %v5540_v40 }
 0x269   : > { %5559 = vst [vmem:[#allocation32_spill] sm:$0xff] %v4349_v33  ;;  %2623 = vrcp.f32 %v4442_v51  ;;  %v4475_v52 = vmul.f32 %v1749_v58, %v5532_v43  ;;  %v1784_v43 = vand.u32 2147483648, %v4380_v21  ;;  %v1799_v7 = vand.u32 2147483648, %v4386_v16 }
 0x26a   : > { %5560 = vst [vmem:[#allocation43_spill] sm:$0xff] %v4352_v28  ;;  %2625 = vrcp.f32 %v4457_v29  ;;  %vm1778_vm1 = vweird.f32 %v4380_v21  ;;  %vm1793_vm2 = vweird.f32 %v4386_v16  ;;  %vm1808_vm3 = vweird.f32 %v4402_v6 }
 0x26b   : > { %5561 = vst [vmem:[#allocation45_spill] sm:$0xff] %v4357_v14  ;;  %v1755_v14 = vmul.f32 2.0, %v5548_v35  ;;  %vm1823_vm4 = vweird.f32 %v4407_v24  ;;  %v1829_v17 = vand.u32 2147483648, %v4407_v24  ;;  %vm1838_vm8 = vweird.f32 %v4413_v0 }
 0x26c   : > { %5562 = vst [vmem:[#allocation47_spill] sm:$0xff] %v4360_v5  ;;  %v1754_v5 = vmul.f32 2.0, %v5546_v9  ;;  %2627 = vrcp.f32 %v4467_v22 }
 0x26d   : > { %5563 = vst [vmem:[#allocation34_spill] sm:$0xff] %v4376_v62  ;;  %v4393_v62 = vmul.f32 %v4235_v10, %v4235_v10  ;;  %v4429_v10 = vmul.f32 0.6931472, %v2608_v61  ;;  %v4445_v61 = vpop.eup %2613  ;;  %v4499_v40 = vmul.f32 %v1755_v14, %v5548_v35  ;;  %v1797_v14 = vand.u32 2147483647, %v4386_v16 }
 0x26e   : > { %5565 = vst [vmem:[#allocation36_spill] sm:$0xff] %v4399_v18  ;;  %v4451_v37 = vpop.eup %2615  ;;  %v1774_v28 = vmul.f32 %v4445_v61, %v4380_v21  ;;  %v4491_v18 = vmul.f32 %v1753_v53, %v5545_v49  ;;  %v4496_v27 = vmul.f32 %v1754_v5, %v5546_v9  ;;  %v1814_v49 = vand.u32 2147483648, %v4402_v6 }
 0x26f   : > { %5564 = vst [vmem:[#allocation49_spill] sm:$0xff] %v4393_v62  ;;  %v1789_v47 = vmul.f32 %v4451_v37, %v4386_v16  ;;  %vm4536_vm6 = vcmp.eq.f32.partialorder %v1797_v14, 8.507059e+37  ;;  %vm1779_vm7 = vweird.f32 %v4445_v61  ;;  %vm1794_vm9 = vweird.f32 %v4451_v37 }
 0x270   : > { %5566 = vst [vmem:[#allocation38_spill] sm:$0xff] %v4417_v11  ;;  %vm4565_vm13 = vmor %vm1778_vm1, %vm1779_vm7  ;;  %2629 = vrcp.f32 %v4475_v52 }
 0x271   : > { %5567 = vst [vmem:[#allocation40_spill] sm:$0xff] %v4419_v23  ;;  %v1790_v9 = vsub.f32 1.0, %v1789_v47  ;;  %vm4574_vm14 = vmor %vm1793_vm2, %vm1794_vm9  ;;  %2631 = vrcp.f32 %v4478_v59  ;;  %vm1853_vm9 = vweird.f32 %v4442_v51 }
 0x272   : > { %5568 = vst [vmem:[#allocation42_spill] sm:$0xff] %v4421_v46  ;;  %2633 = vrcp.f32 %v4481_v3 }
 0x273   : > { %5569 = vst [vmem:[#allocation44_spill] sm:$0xff] %v4425_v38  ;;  %v4463_v38 = vpop.eup %2617 }
 0x274   : > { %5570 = vst [vmem:[#allocation46_spill] sm:$0xff] %v4427_v25  ;;  %v4472_v8 = vpop.eup %2619  ;;  %v4488_v25 = vmul.f32 %v1752_v36, %v5543_v57  ;;  %v1804_v41 = vmul.f32 %v4463_v38, %v4402_v6  ;;  %v1775_v57 = vsub.f32 1.0, %v1774_v28  ;;  %v1782_v36 = vand.u32 2147483647, %v4380_v21 }
 0x275   : > { %5571 = vst [vmem:[#allocation48_spill] sm:$0xff] %v4429_v10  ;;  %v4485_v42 = vpop.eup %2621  ;;  %v1819_v58 = vmul.f32 %v4472_v8, %v4407_v24  ;;  %v4517_v28 = vor.u32 1.1754944e-38, %v1784_v43  ;;  %v4532_v43 = vor.u32 1.1754944e-38, %v1814_v49  ;;  %v1827_v10 = vand.u32 2147483647, %v4407_v24 }
 0x276   : > { %5572 = vst [vmem:[#allocation68_spill] sm:$0xff] %v4433_v54  ;;  %v1834_v35 = vmul.f32 %v4485_v42, %v4413_v0  ;;  %v4514_v5 = vpop.eup %2623  ;;  %v4521_v54 = vor.u32 1.1754944e-38, %v1799_v7  ;;  %v1776_v33 = vmul.f32 %v4445_v61, %v1775_v57  ;;  %vm4528_vm5 = vcmp.eq.f32.partialorder %v1782_v36, 8.507059e+37 }
 0x277   : > { %5573 = vst [vmem:[#allocation69_spill] sm:$0xff] %v4435_v15  ;;  %v1756_v15 = vmul.f32 2.0, %v5551_v30  ;;  %v4525_v47 = vpop.eup %2625  ;;  %v1820_v62 = vsub.f32 1.0, %v1819_v58  ;;  %v1791_v7 = vmul.f32 %v4451_v37, %v1790_v9  ;;  %v1849_v57 = vmul.f32 %v4514_v5, %v4442_v51 }
 0x278   : > { %v1835_v23 = vsub.f32 1.0, %v1834_v35  ;;  %v1842_v36 = vand.u32 2147483647, %v4413_v0  ;;  %v1844_v49 = vand.u32 2147483648, %v4413_v0  ;;  %v1864_v14 = vmul.f32 %v4525_v47, %v4457_v29  ;;  %v4600_v45 = vpop.eup %2627 }
 0x279   : > { %v4509_v53 = vmul.f32 %v1756_v15, %v5551_v30  ;;  %v1805_v30 = vsub.f32 1.0, %v1804_v41  ;;  %v1812_v15 = vand.u32 2147483647, %v4402_v6  ;;  %v1777_v35 = vadd.f32 %v4445_v61, %v1776_v33 }
 0x27a   : > { %vm1809_vm11 = vweird.f32 %v4463_v38  ;;  %v1821_v12 = vmul.f32 %v4472_v8, %v1820_v62  ;;  %vm4559_vm12 = vcmp.eq.f32.partialorder %v1827_v10, 8.507059e+37  ;;  %v1836_v39 = vmul.f32 %v4485_v42, %v1835_v23 }
 0x27b   : > { %v1806_v58 = vmul.f32 %v4463_v38, %v1805_v30  ;;  %vm4549_vm10 = vcmp.eq.f32.partialorder %v1812_v15, 8.507059e+37  ;;  %v1792_v15 = vadd.f32 %v4451_v37, %v1791_v7  ;;  %v1850_v2 = vsub.f32 1.0, %v1849_v57  ;;  %vm4591_vm1 = vmor %vm1808_vm3, %vm1809_vm11 }
 0x27c   : > { %vm1824_vm15 = vweird.f32 %v4472_v8  ;;  %v1830_v21 = vor.u32 1.1754944e-38, %v1829_v17  ;;  %v1857_v33 = vand.u32 2147483647, %v4442_v51  ;;  %v1859_v10 = vand.u32 2147483648, %v4442_v51 }
 0x27d   : > { %v1807_v7 = vadd.f32 %v4463_v38, %v1806_v58  ;;  %vm1839_vm0 = vweird.f32 %v4485_v42  ;;  %v1865_v23 = vsub.f32 1.0, %v1864_v14  ;;  %v1781_v16 = vsel %vm4565_vm13, %v4445_v61, %v1777_v35  ;;  %vm4609_vm3 = vmor %vm1823_vm4, %vm1824_vm15 }
 0x27e   : > { %v1822_v57 = vadd.f32 %v4472_v8, %v1821_v12  ;;  %vm4596_vm2 = vcmp.eq.f32.partialorder %v1842_v36, 8.507059e+37  ;;  %v1845_v14 = vor.u32 1.1754944e-38, %v1844_v49  ;;  %v1796_v61 = vsel %vm4574_vm14, %v4451_v37, %v1792_v15  ;;  %vm4618_vm7 = vmor %vm1838_vm8, %vm1839_vm0  ;;  %v5604_v37 = vld [vmem:[#allocation53_spill] sm:$0xff] }
 0x27f   : > { %v1837_v12 = vadd.f32 %v4485_v42, %v1836_v39  ;;  %v1851_v36 = vmul.f32 %v4514_v5, %v1850_v2  ;;  %vm4623_vm11 = vcmp.eq.f32.partialorder %v1857_v33, 8.507059e+37  ;;  %v1860_v24 = vor.u32 1.1754944e-38, %v1859_v10  ;;  %v4628_v39 = vpop.eup %2629 }
 0x280   : > { %2635 = vrcp.f32 %v4488_v25  ;;  %v1786_v2 = vsel %vm4528_vm5, %v4517_v28, %v1781_v16  ;;  %v1811_v0 = vsel %vm4591_vm1, %v4463_v38, %v1807_v7  ;;  %vm1854_vm4 = vweird.f32 %v4514_v5  ;;  %v4647_v28 = vpop.eup %2631 }
 0x281   : > { %v1866_v35 = vmul.f32 %v4525_v47, %v1865_v23  ;;  %v1801_v30 = vsel %vm4536_vm6, %v4521_v54, %v1796_v61  ;;  %v1826_v15 = vsel %vm4609_vm3, %v4472_v8, %v1822_v57  ;;  %vm1868_vm8 = vweird.f32 %v4457_v29  ;;  %vm4663_vm6 = vmor %vm1853_vm9, %vm1854_vm4  ;;  %v4670_v7 = vpop.eup %2633 }
 0x282   : > { %v1879_v46 = vmul.f32 %v4600_v45, %v4467_v22  ;;  %v1841_v38 = vsel %vm4618_vm7, %v4485_v42, %v1837_v12  ;;  %v1852_v62 = vadd.f32 %v4514_v5, %v1851_v36  ;;  %vm1869_vm5 = vweird.f32 %v4525_v47 }
 0x283   : > { %v1872_v54 = vand.u32 2147483647, %v4457_v29  ;;  %v4656_v41 = vmul.f32 %v1786_v2, %v4248_v48  ;;  %v1816_v8 = vsel %vm4549_vm10, %v4532_v43, %v1811_v0  ;;  %v1874_v42 = vand.u32 2147483648, %v4457_v29  ;;  %vm4685_vm10 = vmor %vm1868_vm8, %vm1869_vm5  ;;  %v5651_v2 = vld [vmem:[#allocation50_spill] sm:$0xff] }
 0x284   : > { %v1894_v10 = vmul.f32 %v4628_v39, %v4475_v52  ;;  %v4673_v48 = vmul.f32 %v1801_v30, %v4252_v20  ;;  %v1831_v9 = vsel %vm4559_vm12, %v1830_v21, %v1826_v15  ;;  %v1867_v43 = vadd.f32 %v4525_v47, %v1866_v35 }
 0x285   : > { %v1887_v51 = vand.u32 2147483647, %v4467_v22  ;;  %v1846_v16 = vsel %vm4596_vm2, %v1845_v14, %v1841_v38  ;;  %v1880_v20 = vsub.f32 1.0, %v1879_v46  ;;  %v1889_v57 = vand.u32 2147483648, %v4467_v22 }
 0x286   : > { %v4679_v23 = vpop.eup %2635  ;;  %v1909_v11 = vmul.f32 %v4647_v28, %v4478_v59  ;;  %v4693_v21 = vmul.f32 %v1816_v8, %v4254_v13  ;;  %v1856_v58 = vsel %vm4663_vm6, %v4514_v5, %v1852_v62  ;;  %vm4698_vm12 = vcmp.eq.f32.partialorder %v1872_v54, 8.507059e+37 }
 0x287   : > { %2637 = vrcp.f32 %v4491_v18  ;;  %v4704_v29 = vmul.f32 %v1831_v9, %v4256_v44  ;;  %v1875_v61 = vor.u32 1.1754944e-38, %v1874_v42  ;;  %v1895_v6 = vsub.f32 1.0, %v1894_v10  ;;  %v5605_v10 = vld [vmem:[#allocation54_spill] sm:$0xff]  ;;  %v5606_v9 = vld [vmem:[#allocation21_spill] sm:$0xff] }
 0x288   : > { %v1924_v12 = vmul.f32 %v4670_v7, %v4481_v3  ;;  %v4709_v13 = vmul.f32 %v1846_v16, %v4262_v19  ;;  %v1871_v5 = vsel %vm4685_vm10, %v4525_v47, %v1867_v43  ;;  %vm1883_vm13 = vweird.f32 %v4467_v22 }
 0x289   : > { %v1939_v36 = vmul.f32 %v4679_v23, %v4488_v25  ;;  %v1861_v44 = vsel %vm4623_vm11, %v1860_v24, %v1856_v58  ;;  %v1881_v49 = vmul.f32 %v4600_v45, %v1880_v20  ;;  %vm4720_vm14 = vcmp.eq.f32.partialorder %v1887_v51, 8.507059e+37 }
 0x28a   : > { %v1890_v19 = vor.u32 1.1754944e-38, %v1889_v57  ;;  %v1910_v0 = vsub.f32 1.0, %v1909_v11  ;;  %vm1898_vm15 = vweird.f32 %v4475_v52  ;;  %v1902_v47 = vand.u32 2147483647, %v4475_v52  ;;  %v5613_v11 = vld [vmem:[#allocation55_spill] sm:$0xff] }
 0x28b   : > { %v1904_v35 = vand.u32 2147483648, %v4475_v52  ;;  %v1917_v30 = vand.u32 2147483647, %v4478_v59  ;;  %vm1573_vm0 = vcmp.lt.s32.totalorder %v4106_v32, 200  ;;  %vm1589_vm1 = vcmp.lt.s32.totalorder %v5604_v37, 32 }
 0x28c   : > { %v1876_v24 = vsel %vm4698_vm12, %v1875_v61, %v1871_v5  ;;  %vm1884_vm2 = vweird.f32 %v4600_v45  ;;  %v1896_v15 = vmul.f32 %v4628_v39, %v1895_v6  ;;  %v1925_v46 = vsub.f32 1.0, %v1924_v12 }
 0x28d   : > { %v4734_v38 = vpop.eup %2637  ;;  %vm1574_vm3 = vcmp.lt.s32.totalorder %v4109_v63, 200  ;;  %v4738_v62 = vmul.f32 %v1861_v44, %v4269_v50  ;;  %v1919_v54 = vand.u32 2147483648, %v4478_v59  ;;  %v1940_v8 = vsub.f32 1.0, %v1939_v36  ;;  %vm4754_vm4 = vmor %vm1883_vm13, %vm1884_vm2  ;;  %v5616_v44 = vld [vmem:[#allocation56_spill] sm:$0xff]  ;;  %v5633_v50 = vld [vmem:[#allocation30_spill] sm:$0xff] }
 0x28e   : > { %2639 = vrcp.f32 %v4496_v27  ;;  %v1882_v33 = vadd.f32 %v4600_v45, %v1881_v49  ;;  %vm1899_vm7 = vweird.f32 %v4628_v39  ;;  %v1911_v42 = vmul.f32 %v4647_v28, %v1910_v0 }
 0x28f   : > { %vm1913_vm9 = vweird.f32 %v4478_v59  ;;  %vm1575_vm11 = vcmp.lt.s32.totalorder %v5605_v10, 200  ;;  %v4748_v43 = vmul.f32 %v1876_v24, %v5606_v9  ;;  %vm4758_vm8 = vcmp.eq.f32.partialorder %v1902_v47, 8.507059e+37  ;;  %vm4774_vm12 = vmor %vm1898_vm15, %vm1899_vm7  ;;  %v5619_v59 = vld [vmem:[#allocation57_spill] sm:$0xff]  ;;  %v5655_v9 = vld [vmem:[#allocation62_spill] sm:$0xff] }
 0x290   : > { %v1905_v16 = vor.u32 1.1754944e-38, %v1904_v35  ;;  %vm4762_vm5 = vcmp.eq.f32.partialorder %v1917_v30, 8.507059e+37  ;;  %v1897_v20 = vadd.f32 %v4628_v39, %v1896_v15  ;;  %vm1914_vm6 = vweird.f32 %v4647_v28  ;;  %v5646_v15 = vld [vmem:[#allocation61_spill] sm:$0xff] }
 0x291   : > { %v1926_v57 = vmul.f32 %v4670_v7, %v1925_v46  ;;  %v1954_v22 = vmul.f32 %v4734_v38, %v4491_v18  ;;  %v1920_v14 = vor.u32 1.1754944e-38, %v1919_v54  ;;  %vm1928_vm13 = vweird.f32 %v4481_v3  ;;  %vm4794_vm7 = vmor %vm1913_vm9, %vm1914_vm6 }
 0x292   : > { %v1932_v61 = vand.u32 2147483647, %v4481_v3  ;;  %v1941_v6 = vmul.f32 %v4679_v23, %v1940_v8  ;;  %v1886_v12 = vsel %vm4754_vm4, %v4600_v45, %v1882_v33  ;;  %v1912_v5 = vadd.f32 %v4647_v28, %v1911_v42  ;;  %v5626_v33 = vld [vmem:[#allocation58_spill] sm:$0xff] }
 0x293   : > { %vm1929_vm2 = vweird.f32 %v4670_v7  ;;  %v1934_v52 = vand.u32 2147483648, %v4481_v3  ;;  %vm1577_vm15 = vcmp.lt.s32.totalorder %v5616_v44, 200  ;;  %vm1943_vm4 = vweird.f32 %v4488_v25 }
 0x294   : > { %v4787_v36 = vpop.eup %2639  ;;  %vm1944_vm10 = vweird.f32 %v4679_v23  ;;  %v1947_v45 = vand.u32 2147483647, %v4488_v25  ;;  %v1949_v0 = vand.u32 2147483648, %v4488_v25  ;;  %v1901_v47 = vsel %vm4774_vm12, %v4628_v39, %v1897_v20  ;;  %vm4814_vm6 = vmor %vm1928_vm13, %vm1929_vm2 }
 0x295   : > { %v1927_v35 = vadd.f32 %v4670_v7, %v1926_v57  ;;  %v1955_v30 = vsub.f32 1.0, %v1954_v22  ;;  %2641 = vrcp.f32 %v4499_v40  ;;  %vm1578_vm9 = vcmp.lt.s32.totalorder %v5619_v59, 200  ;;  %vm4844_vm2 = vmand %vm1573_vm0, %vm1589_vm1  ;;  %v5634_v22 = vld [vmem:[#allocation59_spill] sm:$0xff] }
 0x296   : > { %v1891_v24 = vsel %vm4720_vm14, %v1890_v19, %v1886_v12  ;;  %v1942_v39 = vadd.f32 %v4679_v23, %v1941_v6  ;;  %v1962_v46 = vand.u32 2147483647, %v4491_v18  ;;  %v1964_v54 = vand.u32 2147483648, %v4491_v18  ;;  %vm4832_vm14 = vmor %vm1943_vm4, %vm1944_vm10 }
 0x297   : > { %v1916_v8 = vsel %vm4794_vm7, %v4647_v28, %v1912_v5  ;;  %vm4824_vm12 = vcmp.eq.f32.partialorder %v1932_v61, 8.507059e+37  ;;  %v1969_v19 = vmul.f32 %v4787_v36, %v4496_v27  ;;  %2643 = vrcp.f32 %v4509_v53  ;;  %vm4859_vm4 = vmand %vm1574_vm3, %vm1589_vm1  ;;  %v5639_v5 = vld [vmem:[#allocation60_spill] sm:$0xff] }
 0x298   : > { %vm1579_vm13 = vcmp.lt.s32.totalorder %v5626_v33, 200  ;;  %v1906_v25 = vsel %vm4758_vm8, %v1905_v16, %v1901_v47  ;;  %v1935_v42 = vor.u32 1.1754944e-38, %v1934_v52  ;;  %vm4850_vm10 = vcmp.eq.f32.partialorder %v1947_v45, 8.507059e+37  ;;  %vm4886_vm8 = vmand %vm1575_vm11, %vm1589_vm1  ;;  %v5674_v33 = vld [vmem:[#allocation52_spill] sm:$0xff] }
 0x299   : > { %vm1958_vm7 = vweird.f32 %v4491_v18  ;;  %v4864_v20 = vmul.f32 %v1891_v24, %v5633_v50  ;;  %v1931_v51 = vsel %vm4814_vm6, %v4670_v7, %v1927_v35  ;;  %v1950_v16 = vor.u32 1.1754944e-38, %v1949_v0 }
 0x29a   : > { %v1956_v57 = vmul.f32 %v4734_v38, %v1955_v30  ;;  %v1921_v58 = vsel %vm4762_vm5, %v1920_v14, %v1916_v8  ;;  %v1946_v63 = vsel %vm4832_vm14, %v4679_v23, %v1942_v39  ;;  %vm4876_vm3 = vcmp.eq.f32.partialorder %v1962_v46, 8.507059e+37  ;;  %v5645_v30 = vld [vmem:[#allocation23_spill] sm:$0xff]  ;;  %v5649_v46 = vld [vmem:[#allocation24_spill] sm:$0xff] }
 0x29b   : > { %v1965_v6 = vor.u32 1.1754944e-38, %v1964_v54  ;;  %v4880_v12 = vpop.eup %2641  ;;  %v4891_v17 = vmul.f32 %v1906_v25, %v4288_v26  ;;  %vm1959_vm5 = vweird.f32 %v4734_v38  ;;  %v1970_v23 = vsub.f32 1.0, %v1969_v19  ;;  %v5653_v25 = vld [vmem:[#allocation29_spill] sm:$0xff] }
 0x29c   : > { %v1979_v14 = vand.u32 2147483648, %v4496_v27  ;;  %v1936_v52 = vsel %vm4824_vm12, %v1935_v42, %v1931_v51  ;;  %v1977_v49 = vand.u32 2147483647, %v4496_v27  ;;  %v5640_v10 = vsub.f32 -0.9189385, %v4304_v56 }
 0x29d   : > { %v5641_v26 = vsub.f32 -0.9189385, %v4312_v60  ;;  %v4907_v47 = vpop.eup %2643  ;;  %vm5642_vm11 = vcmp.lt.s32.totalorder %v5613_v11, 200  ;;  %v4918_v56 = vmul.f32 %v1921_v58, %v5645_v30  ;;  %v1951_v24 = vsel %vm4850_vm10, %v1950_v16, %v1946_v63  ;;  %v5659_v63 = vld [vmem:[#allocation51_spill] sm:$0xff]  ;;  %vm4979_vm10 = vmand %vm1578_vm9, %vm1589_vm1 }
 0x29e   : > { %v2030_v45 = vsel %vm4844_vm2, %v5640_v10, 0.0  ;;  %vm4913_vm14 = vmand %vm5642_vm11, %vm1589_vm1  ;;  %v1957_v60 = vadd.f32 %v4734_v38, %v1956_v57  ;;  %vm1973_vm12 = vweird.f32 %v4496_v27  ;;  %vm1974_vm6 = vweird.f32 %v4787_v36 }
 0x29f   : > { %v2031_v0 = vsel %vm4859_vm4, %v5641_v26, 0.0  ;;  %vm1582_vm0 = vcmp.lt.s32.totalorder %v5646_v15, 200  ;;  %vm4930_vm11 = vmor %vm1958_vm7, %vm1959_vm5  ;;  %v1984_v39 = vmul.f32 %v4880_v12, %v4499_v40  ;;  %v5650_v54 = vsub.f32 -0.9189385, %v5649_v46 }
 0x2a0   : > { %v5652_v3 = vsub.f32 -0.9189385, %v5651_v2  ;;  %v5654_v42 = vsub.f32 -0.9189385, %v5653_v25  ;;  %vm4951_vm7 = vmand %vm1577_vm15, %vm1589_vm1  ;;  %v4959_v16 = vor.u32 1.1754944e-38, %v1979_v14  ;;  %v2046_v57 = vadd.f32 %v2031_v0, %v2030_v45  ;;  %v5662_v14 = vld [vmem:[#allocation63_spill] sm:$0xff] }
 0x2a1   : > { %v2013_v8 = vsub.f32 %v5650_v54, %v4656_v41  ;;  %v5658_v41 = vld [vmem:[#allocation25_spill] sm:$0xff]  ;;  %v4962_v58 = vmul.f32 %v1951_v24, %v4370_v31  ;;  %vm1988_vm5 = vweird.f32 %v4499_v40  ;;  %v1999_v44 = vmul.f32 %v4907_v47, %v4509_v53  ;;  %v5667_v54 = vld [vmem:[#allocation31_spill] sm:$0xff]  ;;  %vm5002_vm9 = vmand %vm1579_vm13, %vm1589_vm1 }
 0x2a2   : > { %v2014_v19 = vsub.f32 %v5652_v3, %v4673_v48  ;;  %v2032_v18 = vsel %vm4886_vm8, %v5654_v42, 0.0  ;;  %v4956_v51 = vmul.f32 %v1936_v52, %v5658_v41  ;;  %v1971_v48 = vmul.f32 %v4787_v36, %v1970_v23  ;;  %v5676_v42 = vld [vmem:[#allocation33_spill] sm:$0xff] }
 0x2a3   : > { %v5660_v10 = vsub.f32 -0.9189385, %v5659_v63  ;;  %v5661_v52 = vsub.f32 -0.9189385, %v4318_v1  ;;  %v1961_v45 = vsel %vm4930_vm11, %v4734_v38, %v1957_v60  ;;  %v5665_v1 = vld [vmem:[#allocation26_spill] sm:$0xff]  ;;  %v2047_v24 = vadd.f32 %v2046_v57, %v2032_v18 }
 0x2a4   : > { %v5666_v0 = vsub.f32 -0.9189385, %v5665_v1  ;;  %v1985_v46 = vsub.f32 1.0, %v1984_v39  ;;  %v5668_v2 = vsub.f32 -0.9189385, %v5667_v54  ;;  %v2070_v3 = vsel %vm4844_vm2, %v2013_v8, 0.0 }
 0x2a5   : > { %v2015_v26 = vsub.f32 %v5660_v10, %v4693_v21  ;;  %v2033_v23 = vsel %vm4913_vm14, %v5661_v52, 0.0  ;;  %v1992_v21 = vand.u32 2147483647, %v4499_v40  ;;  %v2071_v11 = vsel %vm4859_vm4, %v2014_v19, 0.0  ;;  %v5671_v39 = vld [vmem:[#allocation64_spill] sm:$0xff]  ;;  %v5681_v10 = vld [vmem:[#allocation65_spill] sm:$0xff] }
 0x2a6   : > { %v2016_v30 = vsub.f32 %v5666_v0, %v4704_v29  ;;  %v2034_v59 = vsel %vm4951_vm7, %v5668_v2, 0.0  ;;  %v5007_v29 = vadd.f32 %v4787_v36, %v1971_v48  ;;  %v1994_v60 = vand.u32 2147483648, %v4499_v40  ;;  %v5690_v0 = vld [vmem:[#allocation66_spill] sm:$0xff]  ;;  %v5710_v40 = vld [vmem:[#allocation27_spill] sm:$0xff] }
 0x2a7   : > { %v2048_v28 = vadd.f32 %v2047_v24, %v2033_v23  ;;  %vm5012_vm15 = vcmp.eq.f32.partialorder %v1977_v49, 8.507059e+37  ;;  %v2000_v8 = vsub.f32 1.0, %v1999_v44  ;;  %v5675_v19 = vsub.f32 -0.9189385, %v5674_v33 }
 0x2a8   : > { %v5677_v18 = vsub.f32 -0.9189385, %v5676_v42  ;;  %v2072_v48 = vsel %vm4886_vm8, %v2015_v26, 0.0  ;;  %vm5678_vm13 = vcmp.lt.s32.totalorder %v5634_v22, 200  ;;  %v1966_v57 = vsel %vm4876_vm3, %v1965_v6, %v1961_v45  ;;  %v5682_v26 = vld [vmem:[#allocation28_spill] sm:$0xff]  ;;  %v5736_v6 = vld [vmem:[#allocation42_spill] sm:$0xff] }
 0x2a9   : > { %v2017_v25 = vsub.f32 %v5675_v19, %v4709_v13  ;;  %vm5029_vm4 = vmand %vm5678_vm13, %vm1589_vm1  ;;  %v2007_v13 = vand.u32 2147483647, %v4509_v53  ;;  %v2049_v44 = vadd.f32 %v2048_v28, %v2034_v59  ;;  %v2086_v63 = vadd.f32 %v2071_v11, %v2070_v3  ;;  %v5703_v28 = vld [vmem:[#allocation35_spill] sm:$0xff] }
 0x2aa   : > { %v2035_v41 = vsel %vm4979_vm10, %v5677_v18, 0.0  ;;  %v1986_v7 = vmul.f32 %v4880_v12, %v1985_v46  ;;  %v5683_v52 = vsub.f32 -0.9189385, %v5682_v26  ;;  %v5684_v22 = vsub.f32 -0.9189385, %v4330_v55  ;;  %v5752_v26 = vld [vmem:[#allocation44_spill] sm:$0xff] }
 0x2ab   : > { %v2073_v61 = vsel %vm4913_vm14, %v2016_v30, 0.0  ;;  %vm5685_vm3 = vcmp.lt.s32.totalorder %v5639_v5, 200  ;;  %vm1989_vm13 = vweird.f32 %v4880_v12  ;;  %vm5056_vm2 = vcmp.eq.f32.partialorder %v1992_v21, 8.507059e+37  ;;  %vm5065_vm14 = vmor %vm1973_vm12, %vm1974_vm6  ;;  %v5693_v30 = vld [vmem:[#allocation22_spill] sm:$0xff] }
 0x2ac   : > { %v2018_v23 = vsub.f32 %v5683_v52, %v4738_v62  ;;  %v2036_v1 = vsel %vm5002_vm9, %v5684_v22, 0.0  ;;  %vm5051_vm8 = vmand %vm5685_vm3, %vm1589_vm1  ;;  %v2050_v55 = vadd.f32 %v2049_v44, %v2035_v41  ;;  %v2087_v45 = vadd.f32 %v2086_v63, %v2072_v48  ;;  %v5712_v41 = vld [vmem:[#allocation37_spill] sm:$0xff] }
 0x2ad   : > { %v2001_v35 = vmul.f32 %v4907_v47, %v2000_v8  ;;  %v5694_v21 = vsub.f32 -0.9189385, %v5693_v30  ;;  %v5695_v46 = vsub.f32 -0.9189385, %v4333_v34  ;;  %v2074_v2 = vsel %vm4951_vm7, %v2017_v25, 0.0  ;;  %vm5083_vm6 = vmand %vm1582_vm0, %vm1589_vm1  ;;  %v5698_v34 = vld [vmem:[#allocation67_spill] sm:$0xff] }
 0x2ae   : > { %v1995_v59 = vor.u32 1.1754944e-38, %v1994_v60  ;;  %vm2004_vm12 = vweird.f32 %v4907_v47  ;;  %v2088_v3 = vadd.f32 %v2087_v45, %v2073_v61  ;;  %vm1588_vm3 = vcmp.lt.s32.totalorder %v5698_v34, 200  ;;  %vm5115_vm0 = vmor %vm1988_vm5, %vm1989_vm13  ;;  %v5722_v61 = vld [vmem:[#allocation39_spill] sm:$0xff]  ;;  %v5727_v30 = vld [vmem:[#allocation40_spill] sm:$0xff] }
 0x2af   : > { %v2019_v24 = vsub.f32 %v5694_v21, %v4748_v43  ;;  %v2037_v54 = vsel %vm5029_vm4, %v5695_v46, 0.0  ;;  %v2051_v43 = vadd.f32 %v2050_v55, %v2036_v1  ;;  %vm5699_vm11 = vcmp.lt.s32.totalorder %v5655_v9, 200 }
 0x2b0   : > { %vm5093_vm7 = vmand %vm5699_vm11, %vm1589_vm1  ;;  %v1987_v15 = vadd.f32 %v4880_v12, %v1986_v7  ;;  %v5702_v11 = vsub.f32 -0.9189385, %v4295_v4  ;;  %v5704_v8 = vsub.f32 -0.9189385, %v5703_v28  ;;  %v2075_v19 = vsel %vm4979_vm10, %v2018_v23, 0.0  ;;  %v5714_v7 = vld [vmem:[#allocation34_spill] sm:$0xff] }
 0x2b1   : > { %v1976_v9 = vsel %vm5065_vm14, %v4787_v36, %v5007_v29  ;;  %v2052_v25 = vadd.f32 %v2051_v43, %v2037_v54  ;;  %v2089_v42 = vadd.f32 %v2088_v3, %v2074_v2  ;;  %vm5707_vm10 = vcmp.lt.s32.totalorder %v5662_v14, 200 }
 0x2b2   : > { %v2020_v60 = vsub.f32 %v5702_v11, %v4864_v20  ;;  %v2038_v33 = vsel %vm5051_vm8, %v5704_v8, 0.0  ;;  %v2009_v20 = vand.u32 2147483648, %v4509_v53  ;;  %vm5124_vm11 = vmand %vm5707_vm10, %vm1589_vm1  ;;  %v2002_v36 = vadd.f32 %v4907_v47, %v2001_v35  ;;  %v5738_v8 = vld [vmem:[#allocation32_spill] sm:$0xff] }
 0x2b3   : > { %v5711_v29 = vsub.f32 -0.9189385, %v5710_v40  ;;  %v5713_v48 = vsub.f32 -0.9189385, %v5712_v41  ;;  %v2076_v63 = vsel %vm5002_vm9, %v2019_v24, 0.0  ;;  %v1967_v14 = vmul.f32 %v1966_v57, %v5714_v7  ;;  %v5720_v57 = vld [vmem:[#allocation38_spill] sm:$0xff] }
 0x2b4   : > { %vm5715_vm5 = vweird.f32 %v4509_v53  ;;  %vm5147_vm14 = vcmp.eq.f32.partialorder %v2007_v13, 8.507059e+37  ;;  %v2053_v52 = vadd.f32 %v2052_v25, %v2038_v33  ;;  %v2090_v23 = vadd.f32 %v2089_v42, %v2075_v19  ;;  %v5744_v25 = vld [vmem:[#allocation36_spill] sm:$0xff] }
 0x2b5   : > { %v2021_v18 = vsub.f32 %v5711_v29, %v4891_v17  ;;  %v2039_v44 = vsel %vm5083_vm6, %v5713_v48, 0.0  ;;  %vm5143_vm13 = vmor %vm5715_vm5, %vm2004_vm12  ;;  %v1991_v38 = vsel %vm5115_vm0, %v4880_v12, %v1987_v15  ;;  %v5721_v22 = vsub.f32 -0.9189385, %v5720_v57  ;;  %v5735_v15 = vld [vmem:[#allocation49_spill] sm:$0xff]  ;;  %v5747_v29 = vld [vmem:[#allocation43_spill] sm:$0xff] }
 0x2b6   : > { %v5723_v53 = vsub.f32 -0.9189385, %v5722_v61  ;;  %v2077_v13 = vsel %vm5029_vm4, %v2020_v60, 0.0  ;;  %vm5724_vm9 = vcmp.lt.s32.totalorder %v5671_v39, 200  ;;  %v1981_v12 = vsel %vm5012_vm15, %v4959_v16, %v1976_v9  ;;  %v5729_v39 = vld [vmem:[#allocation41_spill] sm:$0xff] }
 0x2b7   : > { %v2022_v1 = vsub.f32 %v5721_v22, %v4918_v56  ;;  %vm5167_vm12 = vmand %vm5724_vm9, %vm1589_vm1  ;;  %v2010_v56 = vor.u32 1.1754944e-38, %v2009_v20  ;;  %v2054_v5 = vadd.f32 %v2053_v52, %v2039_v44  ;;  %v2091_v35 = vadd.f32 %v2090_v23, %v2076_v63  ;;  %v5751_v44 = vld [vmem:[#allocation69_spill] sm:$0xff]  ;;  %v2029_v16 = vld [vmem:[#allocation9] sm:$0x1] }
 0x2b8   : > { %v2040_v55 = vsel %vm5093_vm7, %v5723_v53, 0.0  ;;  %v2006_v49 = vsel %vm5143_vm13, %v4907_v47, %v2002_v36  ;;  %v5728_v21 = vsub.f32 -0.9189385, %v5727_v30  ;;  %v5730_v46 = vsub.f32 -0.9189385, %v5729_v39  ;;  %v5734_v47 = vld [vmem:[#allocation48_spill] sm:$0xff] }
 0x2b9   : > { %v2078_v32 = vsel %vm5051_vm8, %v2021_v18, 0.0  ;;  %vm5731_vm15 = vcmp.lt.s32.totalorder %v5681_v10, 200  ;;  %v1706_v2 = vsub.f32 -0.9189385, %v5734_v47  ;;  %v2055_v43 = vadd.f32 %v2054_v5, %v2040_v55  ;;  %v5745_v36 = vld [vmem:[#allocation46_spill] sm:$0xff]  ;;  %v5753_v23 = vld [vmem:[#allocation45_spill] sm:$0xff] }
 0x2ba   : > { %v2023_v24 = vsub.f32 %v5728_v21, %v4956_v51  ;;  %v2041_v54 = vsel %vm5124_vm11, %v5730_v46, 0.0  ;;  %vm5190_vm4 = vmand %vm5731_vm15, %vm1589_vm1  ;;  %v1996_v51 = vsel %vm5056_vm2, %v1995_v59, %v1991_v38  ;;  %v2092_v3 = vadd.f32 %v2091_v35, %v2077_v13  ;;  %v5743_v59 = vld [vmem:[#allocation68_spill] sm:$0xff] }
 0x2bb   : > { %v1982_v11 = vmul.f32 %v1981_v12, %v5735_v15  ;;  %v5737_v60 = vsub.f32 -0.9189385, %v5736_v6  ;;  %v5739_v33 = vsub.f32 -0.9189385, %v5738_v8  ;;  %v2079_v19 = vsel %vm5083_vm6, %v2022_v1, 0.0  ;;  %vm5231_vm6 = vmand %vm1588_vm3, %vm1589_vm1  ;;  %v5755_v1 = vld [vmem:[#allocation47_spill] sm:$0xff] }
 0x2bc   : > { %vm5740_vm2 = vcmp.lt.s32.totalorder %v5690_v0, 200  ;;  %v1707_v9 = vsub.f32 -0.9189385, %v5743_v59  ;;  %v2056_v4 = vadd.f32 %v2055_v43, %v2041_v54  ;;  %v2093_v20 = vadd.f32 %v2092_v3, %v2078_v32 }
 0x2bd   : > { %v2024_v28 = vsub.f32 %v5737_v60, %v4962_v58  ;;  %v2042_v10 = vsel %vm5167_vm12, %v5739_v33, 0.0  ;;  %vm5211_vm8 = vmand %vm5740_vm2, %vm1589_vm1  ;;  %v2011_v58 = vsel %vm5147_vm14, %v2010_v56, %v2006_v49  ;;  %v1997_v42 = vmul.f32 %v1996_v51, %v5744_v25  ;;  %v2069_v60 = vld [vmem:[#allocation11] sm:$0x1] }
 0x2be   : > { %v5746_v27 = vsub.f32 -0.9189385, %v5745_v36  ;;  %v5748_v18 = vsub.f32 -0.9189385, %v5747_v29  ;;  %v2080_v41 = vsel %vm5093_vm7, %v2023_v24, 0.0  ;;  %v2057_v7 = vadd.f32 %v2056_v4, %v2042_v10 }
 0x2bf   : > { %v1708_v63 = vsub.f32 -0.9189385, %v5751_v44  ;;  %v2012_v17 = vmul.f32 %v2011_v58, %v5752_v26  ;;  %v2026_v52 = vsub.f32 %v1706_v2, %v1982_v11  ;;  %v5754_v38 = vsub.f32 -0.9189385, %v5753_v23 }
 0x2c0   : > { %v2025_v40 = vsub.f32 %v5746_v27, %v1967_v14  ;;  %v2043_v0 = vsel %vm5190_vm4, %v5748_v18, 0.0  ;;  %v2094_v14 = vadd.f32 %v2093_v20, %v2079_v19  ;;  %v2081_v37 = vsel %vm5124_vm11, %v2024_v28, 0.0 }
 0x2c1   : > { %v2044_v50 = vsel %vm5211_vm8, %v5754_v38, 0.0  ;;  %v2058_v34 = vadd.f32 %v2057_v7, %v2043_v0  ;;  %v2027_v22 = vsub.f32 %v1707_v9, %v1997_v42  ;;  %v5756_v61 = vsub.f32 -0.9189385, %v5755_v1 }
 0x2c2   : > { %v2095_v57 = vadd.f32 %v2094_v14, %v2080_v41  ;;  %v2082_v55 = vsel %vm5167_vm12, %v2025_v40, 0.0  ;;  %v2028_v56 = vsub.f32 %v1708_v63, %v2012_v17  ;;  %v2083_v5 = vsel %vm5190_vm4, %v2026_v52, 0.0 }
 0x2c3   : > { %v2045_v53 = vsel %vm5231_vm6, %v5756_v61, 0.0  ;;  %v2059_v13 = vadd.f32 %v2058_v34, %v2044_v50  ;;  %v2084_v49 = vsel %vm5211_vm8, %v2027_v22, 0.0 }
 0x2c4   : > { %v2096_v12 = vadd.f32 %v2095_v57, %v2081_v37  ;;  %v2085_v24 = vsel %vm5231_vm6, %v2028_v56, 0.0 }
 0x2c5   : > { %v2060_v35 = vadd.f32 %v2059_v13, %v2045_v53 }
 0x2c6   : > { %v2097_v31 = vadd.f32 %v2096_v12, %v2082_v55 }
 0x2c7   : > { %v2061_v30 = vrot.slane %v2060_v35, 4 }
 0x2c8   : > { %v2098_v21 = vadd.f32 %v2097_v31, %v2083_v5 }
 0x2c9   : > { %v2062_v39 = vadd.f32 %v2061_v30, %v2060_v35 }
 0x2ca   : > { %v2099_v46 = vadd.f32 %v2098_v21, %v2084_v49 }
 0x2cb   : > { %v2063_v45 = vrot.slane %v2062_v39, 2 }
 0x2cc   : > { %v2100_v54 = vadd.f32 %v2099_v46, %v2085_v24 }
 0x2cd   : > { %v2064_v32 = vadd.f32 %v2063_v45, %v2062_v39 }
 0x2ce   : > { %v2101_v47 = vrot.slane %v2100_v54, 4 }
 0x2cf   : > { %v2065_v2 = vrot.slane %v2064_v32, 1 }
 0x2d0   : > { %v2102_v51 = vadd.f32 %v2101_v47, %v2100_v54 }
 0x2d1   : > { %v2066_v43 = vadd.f32 %v2065_v2, %v2064_v32 }
 0x2d2   : > { %v2103_v3 = vrot.slane %v2102_v51, 2 }
 0x2d3   : > { %v2067_v15 = vadd.f32 %v2066_v43, %v2029_v16 }
 0x2d4   : > { %v2104_v11 = vadd.f32 %v2103_v3, %v2102_v51 }
 0x2d5   : > { %2068 = vst [vmem:[#allocation9] sm:$0x1] %v2067_v15 }
 0x2d6   : > { %v2105_v6 = vrot.slane %v2104_v11, 1  ;;  %2425 = dma.vmem_to_hbm [thread:$0]  (%p2445_p0), %s2133_s23, 16, %s2135_s7, [#allocation10]  }
 0x2d8   : > { %v2106_v28 = vadd.f32 %v2105_v6, %v2104_v11 }
 0x2da   : > { %v2107_v8 = vadd.f32 %v2106_v28, %v2069_v60 }
 0x2dc   : > { %2108 = vst [vmem:[#allocation11] sm:$0x1] %v2107_v8 }
 0x2dd   : > { %2427 = dma.vmem_to_hbm [thread:$0]  (%p2445_p0), %s2145_s10, 16, %s2147_s20, [#allocation10]  }
 0x2de   : > { %2852 = dma.done.wait (%p2445_p0), [#allocation4], 2048  }
 0x2df   : > { %2854 = vsyncadd (%p2445_p0), [#allocation4], 4294965248 }
 0x2e0   : > { %2856 = dma.done.wait (%p2445_p0), [#allocation10], 32  }
 0x2e1   : > { %2858 = vsyncadd (%p2445_p0), [#allocation10], 4294967264 }
 0x2e2 PF: > { %s5757_s21 = sld [smem:[#allocation18_spill]] }
 0x2e3   : > { %s5758_s29 = sld [smem:[#allocation16_spill]] }
 0x2e4   : > { %s5759_s23 = sld [smem:[#allocation20_spill]] }
 0x2e5   : > { %s5760_s24 = sld [smem:[#allocation17_spill]] }
 0x2e6   : > { %s5761_s25 = sld [smem:[#allocation19_spill]] }
 0x2e8   : > { %s25_s26 = sadd.s32 1, %s5757_s21   ;;  %s5762_s21 = smov %s2865_s22 }
 0x2e9   : > { %p22_p1 = scmp.ge.s32.totalorder %s25_s26, 4   ;;  %s5763_s22 = smov %s5758_s29 }
 0x2eb   :  { %24 = sbr.rel (!%p22_p1) target bundleno = 10 (0xa), region = 129 }
 0x2f0   :  { %2170 = vsyncpa [#allocation3], 1 }
 0x2f1   :  { %2172 = vsyncpa [#allocation3 + $0x1], 1 }
 0x2f2   :  { %2173 = vsyncpa [#allocation6], 1 }
 0x2f3   :  { %2175 = vsyncpa [#allocation6 + $0x1], 1 }
 0x2f4   :  { %2176 = vsyncpa [#allocation4], 1 }
 0x2f5   :  { %2178 = vsyncpa [#allocation4 + $0x1], 1 }
 0x2f6   :  { %2179 = vsyncpa [#allocation10], 1 }

</bundles_post_ra>
